<compile_context>
chip_gen: v6e
topology: v6e:2x2x1
jax: 0.10.0
libtpu: 0.0.40
codegen_flags: <defaults>
</compile_context>

<pallas_src>
import functools

import jax
import jax.numpy as jnp
from jax.experimental import pallas as pl
from jax.experimental.pallas import tpu as pltpu


def _latok_input_emb_kernel(
    # scalar-prefetch (SMEM)
    input_ids_smem,     # [B, S] int32
    # auto-pipelined VMEM inputs
    ids_ref,            # [tile_s, 4] int32 : (para, sent+offB, tok+offC, type+offD)
    pos_emb_ref,        # [tile_s, H]       : rows [s*tile_s, s*tile_s+tile_s)
    tbl_ref,            # [Dtot, H]         : concat(a_tbl, b_tbl, c_tbl, type_tbl)
    gamma_ref,          # [1, H] f32
    beta_ref,           # [1, H] f32
    # HBM (manual DMA)
    word_hbm_ref,       # [V, H]
    # output
    out_ref,            # [tile_s, H]
    # scratch
    word_buf,           # [2, tile_s, H] VMEM (double-buffered gathered word rows)
    dma_sem,            # DMA semaphores, shape (2,)
    *,
    eps: float,
    struct_scale: float,
    tile_s: int,
    vocab_size: int,
):
    s = pl.program_id(0)
    b = pl.program_id(1)
    nb = pl.num_programs(1)
    cur = b % 2                               # current gather slot
    base = s * tile_s

    unroll = 8 if tile_s % 8 == 0 else 1

    def issue_gather(batch_idx, slot):
        # tile_s per-row async copies (HBM row -> VMEM row), unrolled x8 so the
        # vector-misc issue slot is the limiter, not the scalar loop body.
        @pl.loop(0, tile_s // unroll)
        def _(c):
            m0 = pl.multiple_of(c * unroll, unroll)
            for u in range(unroll):
                wid = input_ids_smem[batch_idx, base + m0 + u]
                # Clamp to avoid an out-of-bounds DMA on bad ids (the one-hot
                # formulation mapped OOB ids to zeros; a raw gather would be UB).
                wid = jnp.minimum(jnp.maximum(wid, 0), vocab_size - 1)
                pltpu.make_async_copy(
                    word_hbm_ref.at[pl.ds(wid, 1), :],
                    word_buf.at[slot, pl.ds(m0 + u, 1), :],
                    dma_sem.at[slot],
                ).start()

    # ---- 1) gather issue: own rows on the first inner step, and prefetch the
    #         next batch's rows (same seq tile) into the other slot. ----
    @pl.when(b == 0)
    def _():
        issue_gather(b, cur)

    @pl.when(b + 1 < nb)
    def _():
        issue_gather(b + 1, 1 - cur)

    # ---- 2) position embeddings: pure BlockSpec slice, zero compute ----
    pos_e = pos_emb_ref[...].astype(jnp.float32)                # [tile_s, H]

    # ---- 3) struct + token-type lookups: ONE multi-hot matmul over the fused
    #         table (ids already offset per segment in the wrapper). ----
    ids = ids_ref[...]                                          # [tile_s, 4]
    d_tot = tbl_ref.shape[0]
    iota = jax.lax.broadcasted_iota(jnp.int32, (tile_s, d_tot), 1)
    struct_hot = ((ids[:, 0:1] == iota).astype(jnp.float32)
                  + (ids[:, 1:2] == iota).astype(jnp.float32)
                  + (ids[:, 2:3] == iota).astype(jnp.float32))
    if struct_scale != 1.0:                                     # comb_mode == 'mean'
        struct_hot = struct_hot * struct_scale
    multi_hot = struct_hot + (ids[:, 3:4] == iota).astype(jnp.float32)
    lookup = jnp.dot(multi_hot, tbl_ref[...].astype(jnp.float32),
                     preferred_element_type=jnp.float32)        # [tile_s, H]

    # ---- 4) single full-buffer wait: DMA semaphores count bytes, so one
    #         [tile_s, H]-sized wait clears all tile_s row-copy starts. ----
    pltpu.make_async_copy(
        word_hbm_ref.at[pl.ds(0, tile_s), :],   # only dst shape / sem matter
        word_buf.at[cur],
        dma_sem.at[cur],
    ).wait()

    emb = word_buf[cur].astype(jnp.float32) + pos_e + lookup

    # ---- 5) BertLayerNorm over H (f32 statistics, biased variance) ----
    mean = jnp.mean(emb, axis=-1, keepdims=True)
    centered = emb - mean
    var = jnp.mean(centered * centered, axis=-1, keepdims=True)
    normed = centered * jax.lax.rsqrt(var + eps)
    out_ref[...] = (normed * gamma_ref[...].astype(jnp.float32)
                    + beta_ref[...].astype(jnp.float32)).astype(out_ref.dtype)
    # TODO(synk): nn.Dropout omitted (identity at inference).


def _pick_tile(seq_len, hidden, word_bytes, pos_bytes, out_bytes,
               vmem_budget=24 * 1024 * 1024):
    candidates = [t for t in (2048, 1024, 512, 256, 128, 64, 32, 16, 8)
                  if seq_len % t == 0]
    if not candidates:
        raise NotImplementedError("sequence length must be a multiple of 8")
    # per-step footprint: double-buffered pos + out blocks, 2-slot word_buf,
    # lane-padded ids block (4 -> 128 lanes, double buffered).
    per_row = hidden * (2 * pos_bytes + 2 * out_bytes + 2 * word_bytes) + 2 * 128 * 4
    for t in candidates:
        if t * per_row <= vmem_budget:
            return t
    return candidates[-1]


def latok_input_emb(
    input_ids,          # [B, S] int
    tok_struct_vec,     # [B, S, 3] int  (para, sent, tok ids)
    word_emb,           # [V, H]
    pos_emb,            # [P, H]
    type_emb,           # [T, H]
    a_pos_emb,          # [max_nsent, H]
    b_pos_emb,          # [max_nsent, H]
    c_pos_emb,          # [max_pos,   H]
    gamma,              # [H]
    beta,               # [H]
    *,
    token_type_ids=None,
    eps: float = 1e-12,
    comb_mode: str = "sum",
    out_dtype=None,
):
    if comb_mode not in ("sum", "mean"):
        # TODO(synk): 'concat' mode (three H/3-wide tables) not implemented here.
        raise ValueError("comb_mode must be one of ['sum', 'mean']")

    B, S = input_ids.shape
    V, H = word_emb.shape
    P = pos_emb.shape[0]
    if S > P:
        raise ValueError("sequence length exceeds max_position_embeddings")

    if token_type_ids is None:
        token_type_ids = jnp.zeros_like(input_ids)
    if out_dtype is None:
        out_dtype = word_emb.dtype

    # Fuse the three struct tables AND the token-type table into one table; offset
    # the ids so a single multi-hot matmul performs all four lookups at once.
    fused_tbl = jnp.concatenate([a_pos_emb, b_pos_emb, c_pos_emb, type_emb], axis=0)
    off_b = a_pos_emb.shape[0]
    off_c = off_b + b_pos_emb.shape[0]
    off_d = off_c + c_pos_emb.shape[0]
    d_tot = fused_tbl.shape[0]

    para = tok_struct_vec[:, :, 0].astype(jnp.int32)
    sent = tok_struct_vec[:, :, 1].astype(jnp.int32) + off_b
    tokp = tok_struct_vec[:, :, 2].astype(jnp.int32) + off_c
    ttyp = token_type_ids.astype(jnp.int32) + off_d
    ids_vec = jnp.stack([para, sent, tokp, ttyp], axis=-1)       # [B, S, 4] int32

    word_bytes = jnp.dtype(word_emb.dtype).itemsize
    pos_bytes = jnp.dtype(pos_emb.dtype).itemsize
    out_bytes = jnp.dtype(out_dtype).itemsize
    tile_s = _pick_tile(S, H, word_bytes, pos_bytes, out_bytes)
    grid = (S // tile_s, B)        # seq tiles leading (megacore), batch inner

    struct_scale = (1.0 / 3.0) if comb_mode == "mean" else 1.0

    kernel = functools.partial(
        _latok_input_emb_kernel,
        eps=eps, struct_scale=struct_scale, tile_s=tile_s, vocab_size=V)

    grid_spec = pltpu.PrefetchScalarGridSpec(
        num_scalar_prefetch=1,                       # input_ids -> SMEM
        grid=grid,
        in_specs=[
            pl.BlockSpec((None, tile_s, 4), lambda s, b, ids: (b, s, 0)),
            pl.BlockSpec((tile_s, H),       lambda s, b, ids: (s, 0)),
            pl.BlockSpec((d_tot, H),        lambda s, b, ids: (0, 0)),
            pl.BlockSpec((1, H),            lambda s, b, ids: (0, 0)),
            pl.BlockSpec((1, H),            lambda s, b, ids: (0, 0)),
            pl.BlockSpec(memory_space=pl.ANY),       # word table stays in HBM
        ],
        out_specs=pl.BlockSpec((None, tile_s, H), lambda s, b, ids: (b, s, 0)),
        scratch_shapes=[
            pltpu.VMEM((2, tile_s, H), word_emb.dtype),   # double-buffered gather
            pltpu.SemaphoreType.DMA((2,)),
        ],
    )

    return pl.pallas_call(
        kernel,
        out_shape=jax.ShapeDtypeStruct((B, S, H), out_dtype),
        grid_spec=grid_spec,
        compiler_params=pltpu.CompilerParams(
            dimension_semantics=("parallel", "arbitrary"),
            vmem_limit_bytes=40 * 1024 * 1024),
    )(
        input_ids.astype(jnp.int32),                 # scalar-prefetch (SMEM)
        ids_vec,
        pos_emb,                                     # native dtype (no f32 copy)
        fused_tbl,
        gamma.reshape(1, H).astype(jnp.float32),
        beta.reshape(1, H).astype(jnp.float32),
        word_emb,                                    # native dtype (no f32 copy)
    )


def _reference(input_ids, tok_struct_vec, word_emb, pos_emb, type_emb,
               a_emb, b_emb, c_emb, gamma, beta, token_type_ids, eps, comb_mode):
    B, S = input_ids.shape
    position_ids = jnp.broadcast_to(
        jnp.arange(S, dtype=jnp.int32)[None, :], (B, S))
    if token_type_ids is None:
        token_type_ids = jnp.zeros_like(input_ids)
    words = word_emb[input_ids]
    pos = pos_emb[position_ids]
    typ = type_emb[token_type_ids]
    para = a_emb[tok_struct_vec[:, :, 0]]
    sent = b_emb[tok_struct_vec[:, :, 1]]
    tok = c_emb[tok_struct_vec[:, :, 2]]
    struct = para + sent + tok
    if comb_mode == "mean":
        struct = struct / 3.0
    emb = words + pos + typ + struct
    mean = jnp.mean(emb, axis=-1, keepdims=True)
    var = jnp.mean((emb - mean) ** 2, axis=-1, keepdims=True)
    return (emb - mean) / jnp.sqrt(var + eps) * gamma + beta


if __name__ == "__main__":
    # Small config consistent with the module's __init__.
    B, S, H = 2, 8, 128
    vocab_size = 64
    max_position_embeddings = 32
    type_vocab_size = 2
    max_nsent = 6
    max_pos = 16
    eps = 1e-12

    key = jax.random.PRNGKey(0)
    (k_word, k_pos, k_type, k_a, k_b, k_c,
     k_ids, k_p, k_s, k_t, k_tt) = jax.random.split(key, 11)

    word_emb = 0.02 * jax.random.normal(k_word, (vocab_size, H), jnp.float32)
    word_emb = word_emb.at[0].set(0.0)   # padding_idx=0
    pos_emb = 0.02 * jax.random.normal(
        k_pos, (max_position_embeddings, H), jnp.float32)
    type_emb = 0.02 * jax.random.normal(k_type, (type_vocab_size, H), jnp.float32)
    a_pos_emb = 0.02 * jax.random.normal(k_a, (max_nsent, H), jnp.float32)
    b_pos_emb = 0.02 * jax.random.normal(k_b, (max_nsent, H), jnp.float32)
    c_pos_emb = 0.02 * jax.random.normal(k_c, (max_pos, H), jnp.float32)
    gamma = jnp.ones((H,), jnp.float32)
    beta = jnp.zeros((H,), jnp.float32)

    input_ids = jax.random.randint(k_ids, (B, S), 0, vocab_size, dtype=jnp.int32)
    para_ids = jax.random.randint(k_p, (B, S), 0, max_nsent, dtype=jnp.int32)
    sent_ids = jax.random.randint(k_s, (B, S), 0, max_nsent, dtype=jnp.int32)
    tok_ids = jax.random.randint(k_t, (B, S), 0, max_pos, dtype=jnp.int32)
    tok_struct_vec = jnp.stack([para_ids, sent_ids, tok_ids], axis=-1)
    token_type_ids = jax.random.randint(
        k_tt, (B, S), 0, type_vocab_size, dtype=jnp.int32)

    for comb_mode, tt in (("sum", None), ("mean", token_type_ids)):
        out = latok_input_emb(
            input_ids, tok_struct_vec, word_emb, pos_emb, type_emb,
            a_pos_emb, b_pos_emb, c_pos_emb, gamma, beta,
            token_type_ids=tt, eps=eps, comb_mode=comb_mode,
        )
        out = jax.block_until_ready(out)
        ref = _reference(
            input_ids, tok_struct_vec, word_emb, pos_emb, type_emb,
            a_pos_emb, b_pos_emb, c_pos_emb, gamma, beta, tt, eps, comb_mode)
        assert out.shape == (B, S, H)
        assert jnp.allclose(out, ref, atol=1e-4, rtol=1e-4), (
            f"mismatch vs reference (comb_mode={comb_mode})")

    print("KERNEL_OK")
</pallas_src>

<mosaic_0001>
module attributes {stable_mosaic.version = 11 : i64} {
  func.func @_latok_input_emb_kernel(%arg0: i32, %arg1: i32, %arg2: memref<2x8xi32, #tpu.memory_space<smem>>, %arg3: memref<1x8x4xi32, #tpu.memory_space<vmem>>, %arg4: memref<8x128xf32, #tpu.memory_space<vmem>>, %arg5: memref<30x128xf32, #tpu.memory_space<vmem>>, %arg6: memref<1x128xf32, #tpu.memory_space<vmem>>, %arg7: memref<1x128xf32, #tpu.memory_space<vmem>>, %arg8: memref<64x128xf32, #tpu.memory_space<any>>, %arg9: memref<1x8x128xf32, #tpu.memory_space<vmem>>, %arg10: memref<2x8x128xf32, #tpu.memory_space<vmem>>, %arg11: memref<2x!tpu.dma_semaphore, #tpu.memory_space<semaphore_mem>>) attributes {dimension_semantics = [#tpu.dimension_semantics<parallel>, #tpu.dimension_semantics<arbitrary>], iteration_bounds = array<i64: 1, 2>, scalar_prefetch = 1 : i64, scratch_operands = 2 : i64, tpu.core_type = #tpu.core_type<tc>, window_params = [{transform_indices = @transform_0, window_bounds = array<i64: 1, 8, 4>}, {transform_indices = @transform_1, window_bounds = array<i64: 8, 128>}, {pipeline_mode = #tpu.pipeline_mode<synchronous>, transform_indices = @transform_2, window_bounds = array<i64: 30, 128>}, {pipeline_mode = #tpu.pipeline_mode<synchronous>, transform_indices = @transform_3, window_bounds = array<i64: 1, 128>}, {pipeline_mode = #tpu.pipeline_mode<synchronous>, transform_indices = @transform_4, window_bounds = array<i64: 1, 128>}, {}, {transform_indices = @transform_6, window_bounds = array<i64: 1, 8, 128>}]} {
    %c2_i32 = arith.constant 2 : i32
    %c0_i32 = arith.constant 0 : i32
    %0 = arith.cmpi eq, %c2_i32, %c0_i32 : i32
    %c1_i32 = arith.constant 1 : i32
    %1 = arith.select %0, %c1_i32, %c2_i32 : i32
    %2 = arith.remsi %arg1, %1 : i32
    %c0_i32_0 = arith.constant 0 : i32
    %3 = arith.cmpi ne, %2, %c0_i32_0 : i32
    %c0_i32_1 = arith.constant 0 : i32
    %4 = arith.cmpi slt, %2, %c0_i32_1 : i32
    %c0_i32_2 = arith.constant 0 : i32
    %5 = arith.cmpi slt, %1, %c0_i32_2 : i32
    %6 = arith.xori %4, %5 : i1
    %7 = arith.andi %6, %3 : i1
    %8 = arith.addi %2, %1 : i32
    %9 = arith.select %7, %8, %2 : i32
    %c8_i32 = arith.constant 8 : i32
    %10 = arith.muli %arg0, %c8_i32 : i32
    %c0_i32_3 = arith.constant 0 : i32
    %11 = arith.cmpi eq, %arg1, %c0_i32_3 : i32
    %12 = arith.extui %11 : i1 to i32
    %c0_i32_4 = arith.constant 0 : i32
    %13 = arith.cmpi ne, %12, %c0_i32_4 : i32
    scf.if %13 {
      %c0_i32_32 = arith.constant 0 : i32
      %c1_i32_33 = arith.constant 1 : i32
      %82 = arith.muli %c0_i32_32, %c1_i32_33 : i32
      %c0_i32_34 = arith.constant 0 : i32
      %83 = arith.addi %c0_i32_34, %82 : i32
      %c8_i32_35 = arith.constant 8 : i32
      %84 = arith.muli %83, %c8_i32_35 : i32
      %85 = tpu.assume_multiple %84, 8 : i32
      %86 = arith.addi %10, %85 : i32
      %c0_i32_36 = arith.constant 0 : i32
      %87 = arith.addi %86, %c0_i32_36 : i32
      %88 = arith.index_cast %arg1 : i32 to index
      %89 = arith.index_cast %87 : i32 to index
      %90 = memref.load %arg2[%88, %89] : memref<2x8xi32, #tpu.memory_space<smem>>
      %c0_i32_37 = arith.constant 0 : i32
      %91 = arith.maxsi %90, %c0_i32_37 : i32
      %c63_i32 = arith.constant 63 : i32
      %92 = arith.minsi %91, %c63_i32 : i32
      %c0_i32_38 = arith.constant 0 : i32
      %93 = arith.addi %85, %c0_i32_38 : i32
      %c0_i32_39 = arith.constant 0 : i32
      %94 = tpu.memref_slice %arg8[%92, %c0_i32_39] : memref<64x128xf32, #tpu.memory_space<any>> -> memref<1x128xf32, #tpu.memory_space<any>>
      %c0_i32_40 = arith.constant 0 : i32
      %95 = tpu.memref_slice %arg10[%9, %93, %c0_i32_40] : memref<2x8x128xf32, #tpu.memory_space<vmem>> -> memref<1x1x128xf32, #tpu.memory_space<vmem>>
      %96 = tpu.memref_squeeze %95 : memref<1x1x128xf32, #tpu.memory_space<vmem>> -> memref<1x128xf32, #tpu.memory_space<vmem>>
      %97 = tpu.memref_slice %arg11[%9] : memref<2x!tpu.dma_semaphore, #tpu.memory_space<semaphore_mem>> -> memref<1x!tpu.dma_semaphore, #tpu.memory_space<semaphore_mem>>
      %98 = tpu.memref_squeeze %97 : memref<1x!tpu.dma_semaphore, #tpu.memory_space<semaphore_mem>> -> memref<!tpu.dma_semaphore, #tpu.memory_space<semaphore_mem>>
      tpu.enqueue_dma source(%94 : memref<1x128xf32, #tpu.memory_space<any>>) target(%96 : memref<1x128xf32, #tpu.memory_space<vmem>>) target_semaphore(%98 : memref<!tpu.dma_semaphore, #tpu.memory_space<semaphore_mem>>)
      %99 = arith.addi %10, %85 : i32
      %c1_i32_41 = arith.constant 1 : i32
      %100 = arith.addi %99, %c1_i32_41 : i32
      %101 = arith.index_cast %arg1 : i32 to index
      %102 = arith.index_cast %100 : i32 to index
      %103 = memref.load %arg2[%101, %102] : memref<2x8xi32, #tpu.memory_space<smem>>
      %c0_i32_42 = arith.constant 0 : i32
      %104 = arith.maxsi %103, %c0_i32_42 : i32
      %c63_i32_43 = arith.constant 63 : i32
      %105 = arith.minsi %104, %c63_i32_43 : i32
      %c1_i32_44 = arith.constant 1 : i32
      %106 = arith.addi %85, %c1_i32_44 : i32
      %c0_i32_45 = arith.constant 0 : i32
      %107 = tpu.memref_slice %arg8[%105, %c0_i32_45] : memref<64x128xf32, #tpu.memory_space<any>> -> memref<1x128xf32, #tpu.memory_space<any>>
      %c0_i32_46 = arith.constant 0 : i32
      %108 = tpu.memref_slice %arg10[%9, %106, %c0_i32_46] : memref<2x8x128xf32, #tpu.memory_space<vmem>> -> memref<1x1x128xf32, #tpu.memory_space<vmem>>
      %109 = tpu.memref_squeeze %108 : memref<1x1x128xf32, #tpu.memory_space<vmem>> -> memref<1x128xf32, #tpu.memory_space<vmem>>
      %110 = tpu.memref_slice %arg11[%9] : memref<2x!tpu.dma_semaphore, #tpu.memory_space<semaphore_mem>> -> memref<1x!tpu.dma_semaphore, #tpu.memory_space<semaphore_mem>>
      %111 = tpu.memref_squeeze %110 : memref<1x!tpu.dma_semaphore, #tpu.memory_space<semaphore_mem>> -> memref<!tpu.dma_semaphore, #tpu.memory_space<semaphore_mem>>
      tpu.enqueue_dma source(%107 : memref<1x128xf32, #tpu.memory_space<any>>) target(%109 : memref<1x128xf32, #tpu.memory_space<vmem>>) target_semaphore(%111 : memref<!tpu.dma_semaphore, #tpu.memory_space<semaphore_mem>>)
      %112 = arith.addi %10, %85 : i32
      %c2_i32_47 = arith.constant 2 : i32
      %113 = arith.addi %112, %c2_i32_47 : i32
      %114 = arith.index_cast %arg1 : i32 to index
      %115 = arith.index_cast %113 : i32 to index
      %116 = memref.load %arg2[%114, %115] : memref<2x8xi32, #tpu.memory_space<smem>>
      %c0_i32_48 = arith.constant 0 : i32
      %117 = arith.maxsi %116, %c0_i32_48 : i32
      %c63_i32_49 = arith.constant 63 : i32
      %118 = arith.minsi %117, %c63_i32_49 : i32
      %c2_i32_50 = arith.constant 2 : i32
      %119 = arith.addi %85, %c2_i32_50 : i32
      %c0_i32_51 = arith.constant 0 : i32
      %120 = tpu.memref_slice %arg8[%118, %c0_i32_51] : memref<64x128xf32, #tpu.memory_space<any>> -> memref<1x128xf32, #tpu.memory_space<any>>
      %c0_i32_52 = arith.constant 0 : i32
      %121 = tpu.memref_slice %arg10[%9, %119, %c0_i32_52] : memref<2x8x128xf32, #tpu.memory_space<vmem>> -> memref<1x1x128xf32, #tpu.memory_space<vmem>>
      %122 = tpu.memref_squeeze %121 : memref<1x1x128xf32, #tpu.memory_space<vmem>> -> memref<1x128xf32, #tpu.memory_space<vmem>>
      %123 = tpu.memref_slice %arg11[%9] : memref<2x!tpu.dma_semaphore, #tpu.memory_space<semaphore_mem>> -> memref<1x!tpu.dma_semaphore, #tpu.memory_space<semaphore_mem>>
      %124 = tpu.memref_squeeze %123 : memref<1x!tpu.dma_semaphore, #tpu.memory_space<semaphore_mem>> -> memref<!tpu.dma_semaphore, #tpu.memory_space<semaphore_mem>>
      tpu.enqueue_dma source(%120 : memref<1x128xf32, #tpu.memory_space<any>>) target(%122 : memref<1x128xf32, #tpu.memory_space<vmem>>) target_semaphore(%124 : memref<!tpu.dma_semaphore, #tpu.memory_space<semaphore_mem>>)
      %125 = arith.addi %10, %85 : i32
      %c3_i32 = arith.constant 3 : i32
      %126 = arith.addi %125, %c3_i32 : i32
      %127 = arith.index_cast %arg1 : i32 to index
      %128 = arith.index_cast %126 : i32 to index
      %129 = memref.load %arg2[%127, %128] : memref<2x8xi32, #tpu.memory_space<smem>>
      %c0_i32_53 = arith.constant 0 : i32
      %130 = arith.maxsi %129, %c0_i32_53 : i32
      %c63_i32_54 = arith.constant 63 : i32
      %131 = arith.minsi %130, %c63_i32_54 : i32
      %c3_i32_55 = arith.constant 3 : i32
      %132 = arith.addi %85, %c3_i32_55 : i32
      %c0_i32_56 = arith.constant 0 : i32
      %133 = tpu.memref_slice %arg8[%131, %c0_i32_56] : memref<64x128xf32, #tpu.memory_space<any>> -> memref<1x128xf32, #tpu.memory_space<any>>
      %c0_i32_57 = arith.constant 0 : i32
      %134 = tpu.memref_slice %arg10[%9, %132, %c0_i32_57] : memref<2x8x128xf32, #tpu.memory_space<vmem>> -> memref<1x1x128xf32, #tpu.memory_space<vmem>>
      %135 = tpu.memref_squeeze %134 : memref<1x1x128xf32, #tpu.memory_space<vmem>> -> memref<1x128xf32, #tpu.memory_space<vmem>>
      %136 = tpu.memref_slice %arg11[%9] : memref<2x!tpu.dma_semaphore, #tpu.memory_space<semaphore_mem>> -> memref<1x!tpu.dma_semaphore, #tpu.memory_space<semaphore_mem>>
      %137 = tpu.memref_squeeze %136 : memref<1x!tpu.dma_semaphore, #tpu.memory_space<semaphore_mem>> -> memref<!tpu.dma_semaphore, #tpu.memory_space<semaphore_mem>>
      tpu.enqueue_dma source(%133 : memref<1x128xf32, #tpu.memory_space<any>>) target(%135 : memref<1x128xf32, #tpu.memory_space<vmem>>) target_semaphore(%137 : memref<!tpu.dma_semaphore, #tpu.memory_space<semaphore_mem>>)
      %138 = arith.addi %10, %85 : i32
      %c4_i32 = arith.constant 4 : i32
      %139 = arith.addi %138, %c4_i32 : i32
      %140 = arith.index_cast %arg1 : i32 to index
      %141 = arith.index_cast %139 : i32 to index
      %142 = memref.load %arg2[%140, %141] : memref<2x8xi32, #tpu.memory_space<smem>>
      %c0_i32_58 = arith.constant 0 : i32
      %143 = arith.maxsi %142, %c0_i32_58 : i32
      %c63_i32_59 = arith.constant 63 : i32
      %144 = arith.minsi %143, %c63_i32_59 : i32
      %c4_i32_60 = arith.constant 4 : i32
      %145 = arith.addi %85, %c4_i32_60 : i32
      %c0_i32_61 = arith.constant 0 : i32
      %146 = tpu.memref_slice %arg8[%144, %c0_i32_61] : memref<64x128xf32, #tpu.memory_space<any>> -> memref<1x128xf32, #tpu.memory_space<any>>
      %c0_i32_62 = arith.constant 0 : i32
      %147 = tpu.memref_slice %arg10[%9, %145, %c0_i32_62] : memref<2x8x128xf32, #tpu.memory_space<vmem>> -> memref<1x1x128xf32, #tpu.memory_space<vmem>>
      %148 = tpu.memref_squeeze %147 : memref<1x1x128xf32, #tpu.memory_space<vmem>> -> memref<1x128xf32, #tpu.memory_space<vmem>>
      %149 = tpu.memref_slice %arg11[%9] : memref<2x!tpu.dma_semaphore, #tpu.memory_space<semaphore_mem>> -> memref<1x!tpu.dma_semaphore, #tpu.memory_space<semaphore_mem>>
      %150 = tpu.memref_squeeze %149 : memref<1x!tpu.dma_semaphore, #tpu.memory_space<semaphore_mem>> -> memref<!tpu.dma_semaphore, #tpu.memory_space<semaphore_mem>>
      tpu.enqueue_dma source(%146 : memref<1x128xf32, #tpu.memory_space<any>>) target(%148 : memref<1x128xf32, #tpu.memory_space<vmem>>) target_semaphore(%150 : memref<!tpu.dma_semaphore, #tpu.memory_space<semaphore_mem>>)
      %151 = arith.addi %10, %85 : i32
      %c5_i32 = arith.constant 5 : i32
      %152 = arith.addi %151, %c5_i32 : i32
      %153 = arith.index_cast %arg1 : i32 to index
      %154 = arith.index_cast %152 : i32 to index
      %155 = memref.load %arg2[%153, %154] : memref<2x8xi32, #tpu.memory_space<smem>>
      %c0_i32_63 = arith.constant 0 : i32
      %156 = arith.maxsi %155, %c0_i32_63 : i32
      %c63_i32_64 = arith.constant 63 : i32
      %157 = arith.minsi %156, %c63_i32_64 : i32
      %c5_i32_65 = arith.constant 5 : i32
      %158 = arith.addi %85, %c5_i32_65 : i32
      %c0_i32_66 = arith.constant 0 : i32
      %159 = tpu.memref_slice %arg8[%157, %c0_i32_66] : memref<64x128xf32, #tpu.memory_space<any>> -> memref<1x128xf32, #tpu.memory_space<any>>
      %c0_i32_67 = arith.constant 0 : i32
      %160 = tpu.memref_slice %arg10[%9, %158, %c0_i32_67] : memref<2x8x128xf32, #tpu.memory_space<vmem>> -> memref<1x1x128xf32, #tpu.memory_space<vmem>>
      %161 = tpu.memref_squeeze %160 : memref<1x1x128xf32, #tpu.memory_space<vmem>> -> memref<1x128xf32, #tpu.memory_space<vmem>>
      %162 = tpu.memref_slice %arg11[%9] : memref<2x!tpu.dma_semaphore, #tpu.memory_space<semaphore_mem>> -> memref<1x!tpu.dma_semaphore, #tpu.memory_space<semaphore_mem>>
      %163 = tpu.memref_squeeze %162 : memref<1x!tpu.dma_semaphore, #tpu.memory_space<semaphore_mem>> -> memref<!tpu.dma_semaphore, #tpu.memory_space<semaphore_mem>>
      tpu.enqueue_dma source(%159 : memref<1x128xf32, #tpu.memory_space<any>>) target(%161 : memref<1x128xf32, #tpu.memory_space<vmem>>) target_semaphore(%163 : memref<!tpu.dma_semaphore, #tpu.memory_space<semaphore_mem>>)
      %164 = arith.addi %10, %85 : i32
      %c6_i32 = arith.constant 6 : i32
      %165 = arith.addi %164, %c6_i32 : i32
      %166 = arith.index_cast %arg1 : i32 to index
      %167 = arith.index_cast %165 : i32 to index
      %168 = memref.load %arg2[%166, %167] : memref<2x8xi32, #tpu.memory_space<smem>>
      %c0_i32_68 = arith.constant 0 : i32
      %169 = arith.maxsi %168, %c0_i32_68 : i32
      %c63_i32_69 = arith.constant 63 : i32
      %170 = arith.minsi %169, %c63_i32_69 : i32
      %c6_i32_70 = arith.constant 6 : i32
      %171 = arith.addi %85, %c6_i32_70 : i32
      %c0_i32_71 = arith.constant 0 : i32
      %172 = tpu.memref_slice %arg8[%170, %c0_i32_71] : memref<64x128xf32, #tpu.memory_space<any>> -> memref<1x128xf32, #tpu.memory_space<any>>
      %c0_i32_72 = arith.constant 0 : i32
      %173 = tpu.memref_slice %arg10[%9, %171, %c0_i32_72] : memref<2x8x128xf32, #tpu.memory_space<vmem>> -> memref<1x1x128xf32, #tpu.memory_space<vmem>>
      %174 = tpu.memref_squeeze %173 : memref<1x1x128xf32, #tpu.memory_space<vmem>> -> memref<1x128xf32, #tpu.memory_space<vmem>>
      %175 = tpu.memref_slice %arg11[%9] : memref<2x!tpu.dma_semaphore, #tpu.memory_space<semaphore_mem>> -> memref<1x!tpu.dma_semaphore, #tpu.memory_space<semaphore_mem>>
      %176 = tpu.memref_squeeze %175 : memref<1x!tpu.dma_semaphore, #tpu.memory_space<semaphore_mem>> -> memref<!tpu.dma_semaphore, #tpu.memory_space<semaphore_mem>>
      tpu.enqueue_dma source(%172 : memref<1x128xf32, #tpu.memory_space<any>>) target(%174 : memref<1x128xf32, #tpu.memory_space<vmem>>) target_semaphore(%176 : memref<!tpu.dma_semaphore, #tpu.memory_space<semaphore_mem>>)
      %177 = arith.addi %10, %85 : i32
      %c7_i32 = arith.constant 7 : i32
      %178 = arith.addi %177, %c7_i32 : i32
      %179 = arith.index_cast %arg1 : i32 to index
      %180 = arith.index_cast %178 : i32 to index
      %181 = memref.load %arg2[%179, %180] : memref<2x8xi32, #tpu.memory_space<smem>>
      %c0_i32_73 = arith.constant 0 : i32
      %182 = arith.maxsi %181, %c0_i32_73 : i32
      %c63_i32_74 = arith.constant 63 : i32
      %183 = arith.minsi %182, %c63_i32_74 : i32
      %c7_i32_75 = arith.constant 7 : i32
      %184 = arith.addi %85, %c7_i32_75 : i32
      %c0_i32_76 = arith.constant 0 : i32
      %185 = tpu.memref_slice %arg8[%183, %c0_i32_76] : memref<64x128xf32, #tpu.memory_space<any>> -> memref<1x128xf32, #tpu.memory_space<any>>
      %c0_i32_77 = arith.constant 0 : i32
      %186 = tpu.memref_slice %arg10[%9, %184, %c0_i32_77] : memref<2x8x128xf32, #tpu.memory_space<vmem>> -> memref<1x1x128xf32, #tpu.memory_space<vmem>>
      %187 = tpu.memref_squeeze %186 : memref<1x1x128xf32, #tpu.memory_space<vmem>> -> memref<1x128xf32, #tpu.memory_space<vmem>>
      %188 = tpu.memref_slice %arg11[%9] : memref<2x!tpu.dma_semaphore, #tpu.memory_space<semaphore_mem>> -> memref<1x!tpu.dma_semaphore, #tpu.memory_space<semaphore_mem>>
      %189 = tpu.memref_squeeze %188 : memref<1x!tpu.dma_semaphore, #tpu.memory_space<semaphore_mem>> -> memref<!tpu.dma_semaphore, #tpu.memory_space<semaphore_mem>>
      tpu.enqueue_dma source(%185 : memref<1x128xf32, #tpu.memory_space<any>>) target(%187 : memref<1x128xf32, #tpu.memory_space<vmem>>) target_semaphore(%189 : memref<!tpu.dma_semaphore, #tpu.memory_space<semaphore_mem>>)
      %c1_i32_78 = arith.constant 1 : i32
    } else {
    }
    %c1_i32_5 = arith.constant 1 : i32
    %14 = arith.addi %arg1, %c1_i32_5 : i32
    %c2_i32_6 = arith.constant 2 : i32
    %15 = arith.cmpi slt, %14, %c2_i32_6 : i32
    %16 = arith.extui %15 : i1 to i32
    %c0_i32_7 = arith.constant 0 : i32
    %17 = arith.cmpi ne, %16, %c0_i32_7 : i32
    scf.if %17 {
      %c1_i32_32 = arith.constant 1 : i32
      %82 = arith.addi %arg1, %c1_i32_32 : i32
      %c1_i32_33 = arith.constant 1 : i32
      %83 = arith.subi %c1_i32_33, %9 : i32
      %c0_i32_34 = arith.constant 0 : i32
      %c1_i32_35 = arith.constant 1 : i32
      %84 = arith.muli %c0_i32_34, %c1_i32_35 : i32
      %c0_i32_36 = arith.constant 0 : i32
      %85 = arith.addi %c0_i32_36, %84 : i32
      %c8_i32_37 = arith.constant 8 : i32
      %86 = arith.muli %85, %c8_i32_37 : i32
      %87 = tpu.assume_multiple %86, 8 : i32
      %88 = arith.addi %10, %87 : i32
      %c0_i32_38 = arith.constant 0 : i32
      %89 = arith.addi %88, %c0_i32_38 : i32
      %90 = arith.index_cast %82 : i32 to index
      %91 = arith.index_cast %89 : i32 to index
      %92 = memref.load %arg2[%90, %91] : memref<2x8xi32, #tpu.memory_space<smem>>
      %c0_i32_39 = arith.constant 0 : i32
      %93 = arith.maxsi %92, %c0_i32_39 : i32
      %c63_i32 = arith.constant 63 : i32
      %94 = arith.minsi %93, %c63_i32 : i32
      %c0_i32_40 = arith.constant 0 : i32
      %95 = arith.addi %87, %c0_i32_40 : i32
      %c0_i32_41 = arith.constant 0 : i32
      %96 = tpu.memref_slice %arg8[%94, %c0_i32_41] : memref<64x128xf32, #tpu.memory_space<any>> -> memref<1x128xf32, #tpu.memory_space<any>>
      %c0_i32_42 = arith.constant 0 : i32
      %97 = tpu.memref_slice %arg10[%83, %95, %c0_i32_42] : memref<2x8x128xf32, #tpu.memory_space<vmem>> -> memref<1x1x128xf32, #tpu.memory_space<vmem>>
      %98 = tpu.memref_squeeze %97 : memref<1x1x128xf32, #tpu.memory_space<vmem>> -> memref<1x128xf32, #tpu.memory_space<vmem>>
      %99 = tpu.memref_slice %arg11[%83] : memref<2x!tpu.dma_semaphore, #tpu.memory_space<semaphore_mem>> -> memref<1x!tpu.dma_semaphore, #tpu.memory_space<semaphore_mem>>
      %100 = tpu.memref_squeeze %99 : memref<1x!tpu.dma_semaphore, #tpu.memory_space<semaphore_mem>> -> memref<!tpu.dma_semaphore, #tpu.memory_space<semaphore_mem>>
      tpu.enqueue_dma source(%96 : memref<1x128xf32, #tpu.memory_space<any>>) target(%98 : memref<1x128xf32, #tpu.memory_space<vmem>>) target_semaphore(%100 : memref<!tpu.dma_semaphore, #tpu.memory_space<semaphore_mem>>)
      %101 = arith.addi %10, %87 : i32
      %c1_i32_43 = arith.constant 1 : i32
      %102 = arith.addi %101, %c1_i32_43 : i32
      %103 = arith.index_cast %82 : i32 to index
      %104 = arith.index_cast %102 : i32 to index
      %105 = memref.load %arg2[%103, %104] : memref<2x8xi32, #tpu.memory_space<smem>>
      %c0_i32_44 = arith.constant 0 : i32
      %106 = arith.maxsi %105, %c0_i32_44 : i32
      %c63_i32_45 = arith.constant 63 : i32
      %107 = arith.minsi %106, %c63_i32_45 : i32
      %c1_i32_46 = arith.constant 1 : i32
      %108 = arith.addi %87, %c1_i32_46 : i32
      %c0_i32_47 = arith.constant 0 : i32
      %109 = tpu.memref_slice %arg8[%107, %c0_i32_47] : memref<64x128xf32, #tpu.memory_space<any>> -> memref<1x128xf32, #tpu.memory_space<any>>
      %c0_i32_48 = arith.constant 0 : i32
      %110 = tpu.memref_slice %arg10[%83, %108, %c0_i32_48] : memref<2x8x128xf32, #tpu.memory_space<vmem>> -> memref<1x1x128xf32, #tpu.memory_space<vmem>>
      %111 = tpu.memref_squeeze %110 : memref<1x1x128xf32, #tpu.memory_space<vmem>> -> memref<1x128xf32, #tpu.memory_space<vmem>>
      %112 = tpu.memref_slice %arg11[%83] : memref<2x!tpu.dma_semaphore, #tpu.memory_space<semaphore_mem>> -> memref<1x!tpu.dma_semaphore, #tpu.memory_space<semaphore_mem>>
      %113 = tpu.memref_squeeze %112 : memref<1x!tpu.dma_semaphore, #tpu.memory_space<semaphore_mem>> -> memref<!tpu.dma_semaphore, #tpu.memory_space<semaphore_mem>>
      tpu.enqueue_dma source(%109 : memref<1x128xf32, #tpu.memory_space<any>>) target(%111 : memref<1x128xf32, #tpu.memory_space<vmem>>) target_semaphore(%113 : memref<!tpu.dma_semaphore, #tpu.memory_space<semaphore_mem>>)
      %114 = arith.addi %10, %87 : i32
      %c2_i32_49 = arith.constant 2 : i32
      %115 = arith.addi %114, %c2_i32_49 : i32
      %116 = arith.index_cast %82 : i32 to index
      %117 = arith.index_cast %115 : i32 to index
      %118 = memref.load %arg2[%116, %117] : memref<2x8xi32, #tpu.memory_space<smem>>
      %c0_i32_50 = arith.constant 0 : i32
      %119 = arith.maxsi %118, %c0_i32_50 : i32
      %c63_i32_51 = arith.constant 63 : i32
      %120 = arith.minsi %119, %c63_i32_51 : i32
      %c2_i32_52 = arith.constant 2 : i32
      %121 = arith.addi %87, %c2_i32_52 : i32
      %c0_i32_53 = arith.constant 0 : i32
      %122 = tpu.memref_slice %arg8[%120, %c0_i32_53] : memref<64x128xf32, #tpu.memory_space<any>> -> memref<1x128xf32, #tpu.memory_space<any>>
      %c0_i32_54 = arith.constant 0 : i32
      %123 = tpu.memref_slice %arg10[%83, %121, %c0_i32_54] : memref<2x8x128xf32, #tpu.memory_space<vmem>> -> memref<1x1x128xf32, #tpu.memory_space<vmem>>
      %124 = tpu.memref_squeeze %123 : memref<1x1x128xf32, #tpu.memory_space<vmem>> -> memref<1x128xf32, #tpu.memory_space<vmem>>
      %125 = tpu.memref_slice %arg11[%83] : memref<2x!tpu.dma_semaphore, #tpu.memory_space<semaphore_mem>> -> memref<1x!tpu.dma_semaphore, #tpu.memory_space<semaphore_mem>>
      %126 = tpu.memref_squeeze %125 : memref<1x!tpu.dma_semaphore, #tpu.memory_space<semaphore_mem>> -> memref<!tpu.dma_semaphore, #tpu.memory_space<semaphore_mem>>
      tpu.enqueue_dma source(%122 : memref<1x128xf32, #tpu.memory_space<any>>) target(%124 : memref<1x128xf32, #tpu.memory_space<vmem>>) target_semaphore(%126 : memref<!tpu.dma_semaphore, #tpu.memory_space<semaphore_mem>>)
      %127 = arith.addi %10, %87 : i32
      %c3_i32 = arith.constant 3 : i32
      %128 = arith.addi %127, %c3_i32 : i32
      %129 = arith.index_cast %82 : i32 to index
      %130 = arith.index_cast %128 : i32 to index
      %131 = memref.load %arg2[%129, %130] : memref<2x8xi32, #tpu.memory_space<smem>>
      %c0_i32_55 = arith.constant 0 : i32
      %132 = arith.maxsi %131, %c0_i32_55 : i32
      %c63_i32_56 = arith.constant 63 : i32
      %133 = arith.minsi %132, %c63_i32_56 : i32
      %c3_i32_57 = arith.constant 3 : i32
      %134 = arith.addi %87, %c3_i32_57 : i32
      %c0_i32_58 = arith.constant 0 : i32
      %135 = tpu.memref_slice %arg8[%133, %c0_i32_58] : memref<64x128xf32, #tpu.memory_space<any>> -> memref<1x128xf32, #tpu.memory_space<any>>
      %c0_i32_59 = arith.constant 0 : i32
      %136 = tpu.memref_slice %arg10[%83, %134, %c0_i32_59] : memref<2x8x128xf32, #tpu.memory_space<vmem>> -> memref<1x1x128xf32, #tpu.memory_space<vmem>>
      %137 = tpu.memref_squeeze %136 : memref<1x1x128xf32, #tpu.memory_space<vmem>> -> memref<1x128xf32, #tpu.memory_space<vmem>>
      %138 = tpu.memref_slice %arg11[%83] : memref<2x!tpu.dma_semaphore, #tpu.memory_space<semaphore_mem>> -> memref<1x!tpu.dma_semaphore, #tpu.memory_space<semaphore_mem>>
      %139 = tpu.memref_squeeze %138 : memref<1x!tpu.dma_semaphore, #tpu.memory_space<semaphore_mem>> -> memref<!tpu.dma_semaphore, #tpu.memory_space<semaphore_mem>>
      tpu.enqueue_dma source(%135 : memref<1x128xf32, #tpu.memory_space<any>>) target(%137 : memref<1x128xf32, #tpu.memory_space<vmem>>) target_semaphore(%139 : memref<!tpu.dma_semaphore, #tpu.memory_space<semaphore_mem>>)
      %140 = arith.addi %10, %87 : i32
      %c4_i32 = arith.constant 4 : i32
      %141 = arith.addi %140, %c4_i32 : i32
      %142 = arith.index_cast %82 : i32 to index
      %143 = arith.index_cast %141 : i32 to index
      %144 = memref.load %arg2[%142, %143] : memref<2x8xi32, #tpu.memory_space<smem>>
      %c0_i32_60 = arith.constant 0 : i32
      %145 = arith.maxsi %144, %c0_i32_60 : i32
      %c63_i32_61 = arith.constant 63 : i32
      %146 = arith.minsi %145, %c63_i32_61 : i32
      %c4_i32_62 = arith.constant 4 : i32
      %147 = arith.addi %87, %c4_i32_62 : i32
      %c0_i32_63 = arith.constant 0 : i32
      %148 = tpu.memref_slice %arg8[%146, %c0_i32_63] : memref<64x128xf32, #tpu.memory_space<any>> -> memref<1x128xf32, #tpu.memory_space<any>>
      %c0_i32_64 = arith.constant 0 : i32
      %149 = tpu.memref_slice %arg10[%83, %147, %c0_i32_64] : memref<2x8x128xf32, #tpu.memory_space<vmem>> -> memref<1x1x128xf32, #tpu.memory_space<vmem>>
      %150 = tpu.memref_squeeze %149 : memref<1x1x128xf32, #tpu.memory_space<vmem>> -> memref<1x128xf32, #tpu.memory_space<vmem>>
      %151 = tpu.memref_slice %arg11[%83] : memref<2x!tpu.dma_semaphore, #tpu.memory_space<semaphore_mem>> -> memref<1x!tpu.dma_semaphore, #tpu.memory_space<semaphore_mem>>
      %152 = tpu.memref_squeeze %151 : memref<1x!tpu.dma_semaphore, #tpu.memory_space<semaphore_mem>> -> memref<!tpu.dma_semaphore, #tpu.memory_space<semaphore_mem>>
      tpu.enqueue_dma source(%148 : memref<1x128xf32, #tpu.memory_space<any>>) target(%150 : memref<1x128xf32, #tpu.memory_space<vmem>>) target_semaphore(%152 : memref<!tpu.dma_semaphore, #tpu.memory_space<semaphore_mem>>)
      %153 = arith.addi %10, %87 : i32
      %c5_i32 = arith.constant 5 : i32
      %154 = arith.addi %153, %c5_i32 : i32
      %155 = arith.index_cast %82 : i32 to index
      %156 = arith.index_cast %154 : i32 to index
      %157 = memref.load %arg2[%155, %156] : memref<2x8xi32, #tpu.memory_space<smem>>
      %c0_i32_65 = arith.constant 0 : i32
      %158 = arith.maxsi %157, %c0_i32_65 : i32
      %c63_i32_66 = arith.constant 63 : i32
      %159 = arith.minsi %158, %c63_i32_66 : i32
      %c5_i32_67 = arith.constant 5 : i32
      %160 = arith.addi %87, %c5_i32_67 : i32
      %c0_i32_68 = arith.constant 0 : i32
      %161 = tpu.memref_slice %arg8[%159, %c0_i32_68] : memref<64x128xf32, #tpu.memory_space<any>> -> memref<1x128xf32, #tpu.memory_space<any>>
      %c0_i32_69 = arith.constant 0 : i32
      %162 = tpu.memref_slice %arg10[%83, %160, %c0_i32_69] : memref<2x8x128xf32, #tpu.memory_space<vmem>> -> memref<1x1x128xf32, #tpu.memory_space<vmem>>
      %163 = tpu.memref_squeeze %162 : memref<1x1x128xf32, #tpu.memory_space<vmem>> -> memref<1x128xf32, #tpu.memory_space<vmem>>
      %164 = tpu.memref_slice %arg11[%83] : memref<2x!tpu.dma_semaphore, #tpu.memory_space<semaphore_mem>> -> memref<1x!tpu.dma_semaphore, #tpu.memory_space<semaphore_mem>>
      %165 = tpu.memref_squeeze %164 : memref<1x!tpu.dma_semaphore, #tpu.memory_space<semaphore_mem>> -> memref<!tpu.dma_semaphore, #tpu.memory_space<semaphore_mem>>
      tpu.enqueue_dma source(%161 : memref<1x128xf32, #tpu.memory_space<any>>) target(%163 : memref<1x128xf32, #tpu.memory_space<vmem>>) target_semaphore(%165 : memref<!tpu.dma_semaphore, #tpu.memory_space<semaphore_mem>>)
      %166 = arith.addi %10, %87 : i32
      %c6_i32 = arith.constant 6 : i32
      %167 = arith.addi %166, %c6_i32 : i32
      %168 = arith.index_cast %82 : i32 to index
      %169 = arith.index_cast %167 : i32 to index
      %170 = memref.load %arg2[%168, %169] : memref<2x8xi32, #tpu.memory_space<smem>>
      %c0_i32_70 = arith.constant 0 : i32
      %171 = arith.maxsi %170, %c0_i32_70 : i32
      %c63_i32_71 = arith.constant 63 : i32
      %172 = arith.minsi %171, %c63_i32_71 : i32
      %c6_i32_72 = arith.constant 6 : i32
      %173 = arith.addi %87, %c6_i32_72 : i32
      %c0_i32_73 = arith.constant 0 : i32
      %174 = tpu.memref_slice %arg8[%172, %c0_i32_73] : memref<64x128xf32, #tpu.memory_space<any>> -> memref<1x128xf32, #tpu.memory_space<any>>
      %c0_i32_74 = arith.constant 0 : i32
      %175 = tpu.memref_slice %arg10[%83, %173, %c0_i32_74] : memref<2x8x128xf32, #tpu.memory_space<vmem>> -> memref<1x1x128xf32, #tpu.memory_space<vmem>>
      %176 = tpu.memref_squeeze %175 : memref<1x1x128xf32, #tpu.memory_space<vmem>> -> memref<1x128xf32, #tpu.memory_space<vmem>>
      %177 = tpu.memref_slice %arg11[%83] : memref<2x!tpu.dma_semaphore, #tpu.memory_space<semaphore_mem>> -> memref<1x!tpu.dma_semaphore, #tpu.memory_space<semaphore_mem>>
      %178 = tpu.memref_squeeze %177 : memref<1x!tpu.dma_semaphore, #tpu.memory_space<semaphore_mem>> -> memref<!tpu.dma_semaphore, #tpu.memory_space<semaphore_mem>>
      tpu.enqueue_dma source(%174 : memref<1x128xf32, #tpu.memory_space<any>>) target(%176 : memref<1x128xf32, #tpu.memory_space<vmem>>) target_semaphore(%178 : memref<!tpu.dma_semaphore, #tpu.memory_space<semaphore_mem>>)
      %179 = arith.addi %10, %87 : i32
      %c7_i32 = arith.constant 7 : i32
      %180 = arith.addi %179, %c7_i32 : i32
      %181 = arith.index_cast %82 : i32 to index
      %182 = arith.index_cast %180 : i32 to index
      %183 = memref.load %arg2[%181, %182] : memref<2x8xi32, #tpu.memory_space<smem>>
      %c0_i32_75 = arith.constant 0 : i32
      %184 = arith.maxsi %183, %c0_i32_75 : i32
      %c63_i32_76 = arith.constant 63 : i32
      %185 = arith.minsi %184, %c63_i32_76 : i32
      %c7_i32_77 = arith.constant 7 : i32
      %186 = arith.addi %87, %c7_i32_77 : i32
      %c0_i32_78 = arith.constant 0 : i32
      %187 = tpu.memref_slice %arg8[%185, %c0_i32_78] : memref<64x128xf32, #tpu.memory_space<any>> -> memref<1x128xf32, #tpu.memory_space<any>>
      %c0_i32_79 = arith.constant 0 : i32
      %188 = tpu.memref_slice %arg10[%83, %186, %c0_i32_79] : memref<2x8x128xf32, #tpu.memory_space<vmem>> -> memref<1x1x128xf32, #tpu.memory_space<vmem>>
      %189 = tpu.memref_squeeze %188 : memref<1x1x128xf32, #tpu.memory_space<vmem>> -> memref<1x128xf32, #tpu.memory_space<vmem>>
      %190 = tpu.memref_slice %arg11[%83] : memref<2x!tpu.dma_semaphore, #tpu.memory_space<semaphore_mem>> -> memref<1x!tpu.dma_semaphore, #tpu.memory_space<semaphore_mem>>
      %191 = tpu.memref_squeeze %190 : memref<1x!tpu.dma_semaphore, #tpu.memory_space<semaphore_mem>> -> memref<!tpu.dma_semaphore, #tpu.memory_space<semaphore_mem>>
      tpu.enqueue_dma source(%187 : memref<1x128xf32, #tpu.memory_space<any>>) target(%189 : memref<1x128xf32, #tpu.memory_space<vmem>>) target_semaphore(%191 : memref<!tpu.dma_semaphore, #tpu.memory_space<semaphore_mem>>)
      %c1_i32_80 = arith.constant 1 : i32
    } else {
    }
    %c0 = arith.constant 0 : index
    %c0_8 = arith.constant 0 : index
    %18 = vector.load %arg4[%c0, %c0_8] : memref<8x128xf32, #tpu.memory_space<vmem>>, vector<8x128xf32>
    %c0_9 = arith.constant 0 : index
    %c0_10 = arith.constant 0 : index
    %c0_11 = arith.constant 0 : index
    %19 = vector.load %arg3[%c0_9, %c0_10, %c0_11] : memref<1x8x4xi32, #tpu.memory_space<vmem>>, vector<1x8x4xi32>
    %20 = vector.shape_cast %19 : vector<1x8x4xi32> to vector<8x4xi32>
    %21 = tpu.iota {dimensions = array<i32: 1>} : vector<8x30xi32>
    %22 = vector.extract_strided_slice %20 {offsets = [0, 0], sizes = [8, 1], strides = [1, 1]} : vector<8x4xi32> to vector<8x1xi32>
    %23 = vector.broadcast %22 : vector<8x1xi32> to vector<8x30xi32>
    %24 = arith.cmpi eq, %23, %21 : vector<8x30xi32>
    %25 = arith.extui %24 : vector<8x30xi1> to vector<8x30xi32>
    %26 = arith.sitofp %25 : vector<8x30xi32> to vector<8x30xf32>
    %27 = vector.extract_strided_slice %20 {offsets = [0, 1], sizes = [8, 1], strides = [1, 1]} : vector<8x4xi32> to vector<8x1xi32>
    %28 = vector.broadcast %27 : vector<8x1xi32> to vector<8x30xi32>
    %29 = arith.cmpi eq, %28, %21 : vector<8x30xi32>
    %30 = arith.extui %29 : vector<8x30xi1> to vector<8x30xi32>
    %31 = arith.sitofp %30 : vector<8x30xi32> to vector<8x30xf32>
    %32 = arith.addf %26, %31 : vector<8x30xf32>
    %33 = vector.extract_strided_slice %20 {offsets = [0, 2], sizes = [8, 1], strides = [1, 1]} : vector<8x4xi32> to vector<8x1xi32>
    %34 = vector.broadcast %33 : vector<8x1xi32> to vector<8x30xi32>
    %35 = arith.cmpi eq, %34, %21 : vector<8x30xi32>
    %36 = arith.extui %35 : vector<8x30xi1> to vector<8x30xi32>
    %37 = arith.sitofp %36 : vector<8x30xi32> to vector<8x30xf32>
    %38 = arith.addf %32, %37 : vector<8x30xf32>
    %39 = vector.extract_strided_slice %20 {offsets = [0, 3], sizes = [8, 1], strides = [1, 1]} : vector<8x4xi32> to vector<8x1xi32>
    %40 = vector.broadcast %39 : vector<8x1xi32> to vector<8x30xi32>
    %41 = arith.cmpi eq, %40, %21 : vector<8x30xi32>
    %42 = arith.extui %41 : vector<8x30xi1> to vector<8x30xi32>
    %43 = arith.sitofp %42 : vector<8x30xi32> to vector<8x30xf32>
    %44 = arith.addf %38, %43 : vector<8x30xf32>
    %c0_12 = arith.constant 0 : index
    %c0_13 = arith.constant 0 : index
    %45 = vector.load %arg5[%c0_12, %c0_13] : memref<30x128xf32, #tpu.memory_space<vmem>>, vector<30x128xf32>
    %cst = arith.constant dense<0.000000e+00> : vector<8x128xf32>
    %46 = tpu.matmul %44, %45, %cst {dimension_numbers = #tpu.dot_dimension_numbers<[1], [0], [0], [1], [0, 0, 1, 1], [], []>} : vector<8x30xf32>, vector<30x128xf32>, vector<8x128xf32> -> vector<8x128xf32>
    %c0_i32_14 = arith.constant 0 : i32
    %c0_i32_15 = arith.constant 0 : i32
    %47 = tpu.memref_slice %arg8[%c0_i32_14, %c0_i32_15] : memref<64x128xf32, #tpu.memory_space<any>> -> memref<8x128xf32, #tpu.memory_space<any>>
    %c0_i32_16 = arith.constant 0 : i32
    %c0_i32_17 = arith.constant 0 : i32
    %48 = tpu.memref_slice %arg10[%9, %c0_i32_16, %c0_i32_17] : memref<2x8x128xf32, #tpu.memory_space<vmem>> -> memref<1x8x128xf32, #tpu.memory_space<vmem>>
    %49 = tpu.memref_squeeze %48 : memref<1x8x128xf32, #tpu.memory_space<vmem>> -> memref<8x128xf32, #tpu.memory_space<vmem>>
    %50 = tpu.memref_slice %arg11[%9] : memref<2x!tpu.dma_semaphore, #tpu.memory_space<semaphore_mem>> -> memref<1x!tpu.dma_semaphore, #tpu.memory_space<semaphore_mem>>
    %51 = tpu.memref_squeeze %50 : memref<1x!tpu.dma_semaphore, #tpu.memory_space<semaphore_mem>> -> memref<!tpu.dma_semaphore, #tpu.memory_space<semaphore_mem>>
    tpu.wait_dma2 semaphore(%51 : memref<!tpu.dma_semaphore, #tpu.memory_space<semaphore_mem>>) src(%47 : memref<8x128xf32, #tpu.memory_space<any>>) dst(%49 : memref<8x128xf32, #tpu.memory_space<vmem>>)
    %52 = arith.index_cast %9 : i32 to index
    %c0_18 = arith.constant 0 : index
    %c0_19 = arith.constant 0 : index
    %53 = vector.load %arg10[%52, %c0_18, %c0_19] : memref<2x8x128xf32, #tpu.memory_space<vmem>>, vector<1x8x128xf32>
    %54 = vector.shape_cast %53 : vector<1x8x128xf32> to vector<8x128xf32>
    %55 = arith.addf %54, %18 : vector<8x128xf32>
    %56 = arith.addf %55, %46 : vector<8x128xf32>
    %cst_20 = arith.constant dense<0.000000e+00> : vector<8xf32>
    %57 = vector.multi_reduction <add>, %56, %cst_20 [1] : vector<8x128xf32> to vector<8xf32>
    %58 = vector.shape_cast %57 : vector<8xf32> to vector<8x1xf32>
    %cst_21 = arith.constant 1.280000e+02 : f32
    %59 = vector.broadcast %cst_21 : f32 to vector<8x1xf32>
    %60 = arith.divf %58, %59 : vector<8x1xf32>
    %61 = vector.broadcast %60 : vector<8x1xf32> to vector<8x128xf32>
    %62 = arith.subf %56, %61 : vector<8x128xf32>
    %63 = arith.mulf %62, %62 : vector<8x128xf32>
    %cst_22 = arith.constant dense<0.000000e+00> : vector<8xf32>
    %64 = vector.multi_reduction <add>, %63, %cst_22 [1] : vector<8x128xf32> to vector<8xf32>
    %65 = vector.shape_cast %64 : vector<8xf32> to vector<8x1xf32>
    %cst_23 = arith.constant 1.280000e+02 : f32
    %66 = vector.broadcast %cst_23 : f32 to vector<8x1xf32>
    %67 = arith.divf %65, %66 : vector<8x1xf32>
    %cst_24 = arith.constant 9.99999996E-13 : f32
    %68 = vector.broadcast %cst_24 : f32 to vector<8x1xf32>
    %69 = arith.addf %67, %68 : vector<8x1xf32>
    %70 = math.rsqrt %69 : vector<8x1xf32>
    %71 = vector.broadcast %70 : vector<8x1xf32> to vector<8x128xf32>
    %72 = arith.mulf %62, %71 : vector<8x128xf32>
    %c0_25 = arith.constant 0 : index
    %c0_26 = arith.constant 0 : index
    %73 = vector.load %arg6[%c0_25, %c0_26] : memref<1x128xf32, #tpu.memory_space<vmem>>, vector<1x128xf32>
    %74 = vector.broadcast %73 : vector<1x128xf32> to vector<8x128xf32>
    %75 = arith.mulf %72, %74 : vector<8x128xf32>
    %c0_27 = arith.constant 0 : index
    %c0_28 = arith.constant 0 : index
    %76 = vector.load %arg7[%c0_27, %c0_28] : memref<1x128xf32, #tpu.memory_space<vmem>>, vector<1x128xf32>
    %77 = vector.broadcast %76 : vector<1x128xf32> to vector<8x128xf32>
    %78 = arith.addf %75, %77 : vector<8x128xf32>
    %c0_29 = arith.constant 0 : index
    %c0_30 = arith.constant 0 : index
    %c0_31 = arith.constant 0 : index
    %79 = vector.load %arg9[%c0_29, %c0_30, %c0_31] : memref<1x8x128xf32, #tpu.memory_space<vmem>>, vector<1x8x128xf32>
    %80 = vector.shape_cast %79 : vector<1x8x128xf32> to vector<8x128xf32>
    %81 = vector.shape_cast %78 : vector<8x128xf32> to vector<1x8x128xf32>
    tpu.vector_store %arg9[%c0_29, %c0_30, %c0_31], %81 {strides = array<i32>} : memref<1x8x128xf32, #tpu.memory_space<vmem>>, vector<1x8x128xf32>,
    return
  }
  func.func @transform_0(%arg0: i32, %arg1: i32, %arg2: memref<2x8xi32, #tpu.memory_space<smem>>) -> (i32, i32, i32) {
    %c0_i32 = arith.constant 0 : i32
    %c0_i32_0 = arith.constant 0 : i32
    return %arg1, %arg0, %c0_i32 : i32, i32, i32
  }
  func.func @transform_1(%arg0: i32, %arg1: i32, %arg2: memref<2x8xi32, #tpu.memory_space<smem>>) -> (i32, i32) {
    %c0_i32 = arith.constant 0 : i32
    %c0_i32_0 = arith.constant 0 : i32
    return %arg0, %c0_i32 : i32, i32
  }
  func.func @transform_2(%arg0: i32, %arg1: i32, %arg2: memref<2x8xi32, #tpu.memory_space<smem>>) -> (i32, i32) {
    %c0_i32 = arith.constant 0 : i32
    %c0_i32_0 = arith.constant 0 : i32
    %c0_i32_1 = arith.constant 0 : i32
    return %c0_i32, %c0_i32_0 : i32, i32
  }
  func.func @transform_3(%arg0: i32, %arg1: i32, %arg2: memref<2x8xi32, #tpu.memory_space<smem>>) -> (i32, i32) {
    %c0_i32 = arith.constant 0 : i32
    %c0_i32_0 = arith.constant 0 : i32
    %c0_i32_1 = arith.constant 0 : i32
    return %c0_i32, %c0_i32_0 : i32, i32
  }
  func.func @transform_4(%arg0: i32, %arg1: i32, %arg2: memref<2x8xi32, #tpu.memory_space<smem>>) -> (i32, i32) {
    %c0_i32 = arith.constant 0 : i32
    %c0_i32_0 = arith.constant 0 : i32
    %c0_i32_1 = arith.constant 0 : i32
    return %c0_i32, %c0_i32_0 : i32, i32
  }
  func.func @transform_6(%arg0: i32, %arg1: i32, %arg2: memref<2x8xi32, #tpu.memory_space<smem>>) -> (i32, i32, i32) {
    %c0_i32 = arith.constant 0 : i32
    %c0_i32_0 = arith.constant 0 : i32
    return %arg1, %arg0, %c0_i32 : i32, i32, i32
  }
}

</mosaic_0001>

<bundles_post_ra>
// kernel: tpu_custom_call.1
= control target key start
LH: loop header
LB: loop body
LE: loop exit
PB: predicated region body
PF: predicated region fallthrough
CT: control target
= control target key end

     0   :  { %s2863_s0 = inlined_call_operand.vmem [shape: s32[2,8], index: 0, kind: input, shape index: {}]   ;;  %s2864_s1 = inlined_call_operand.vmem [shape: s32[2,8,4], index: 1, kind: input, shape index: {}]   ;;  %s2865_s2 = inlined_call_operand.hbm [shape: f32[32,128], index: 2, kind: input, shape index: {}]   ;;  %s2866_s3 = inlined_call_operand.hbm [shape: f32[30,128], index: 3, kind: input, shape index: {}]   ;;  %s2867_s4 = inlined_call_operand.vmem [shape: f32[1,128], index: 4, kind: input, shape index: {}]   ;;  %s2868_s5 = inlined_call_operand.vmem [shape: f32[1,128], index: 5, kind: input, shape index: {}]   ;;  %s2869_s6 = inlined_call_operand.hbm [shape: f32[64,128], index: 6, kind: input, shape index: {}]   ;;  %s2870_s7 = inlined_call_operand.hbm [shape: f32[2,8,128], index: 7, kind: output, shape index: {}]  }
   0x1   :  { %2884 = sst [smem:[#allocation74_spill]] %s2864_s1  ;;  %s12_s26 = sshll.u32 %s2863_s0, 4  ;;  %s13_s26 = int_to_ptr.vmem [resolvable:$true] %s12_s26 }
   0x2   :  { %2885 = sst [smem:[#allocation75_spill]] %s2865_s2  ;;  %s1501_s27 = scalar_lea.vmem %s13_s26, 32 }
   0x3   :  { %2886 = sst [smem:[#allocation76_spill]] %s2866_s3  ;;  %p1502_p0 = scmp.ne.s32.totalorder %s13_s26, %s1501_s27 }
   0x4   :  { %2887 = sst [smem:[#allocation77_spill]] %s2870_s7  ;;  %p1506_p1 = scmp.lt.s32.totalorder %s13_s26, %s13_s26 }
   0x5   :  { %p1507_p2 = scmp.lt.s32.totalorder %s1501_s27, %s1501_s27 }
   0x7   :  { %p1508_p3 = por %p1507_p2, %p1506_p1 }
   0x9   :  { %p1509_p4 = pnand %p1508_p3, %p1502_p0 }
   0xb   :  { %1512 = shalt.err (!%p1509_p4)  }
   0xc   :  { %s2071_s28 = smov [#allocation5]  }
   0xd   :  { %15 = dma.vmem_to_smem %s13_s26, 32, %s2071_s28, [#allocation4] }
   0xe   :  { %2031 = dma.done.wait [#allocation4], 32 }
   0xf   :  { %2032 = vsyncadd [#allocation4], 4294967264 }
  0x10   :  { %17 = sfence }
  0x11   :  { %18 = vsyncpa [#allocation7], 0 }
  0x12   :  { %19 = vsyncpa [#allocation10], 0 }
  0x13   :  { %20 = vsyncpa [#allocation8], 0 }
  0x14   :  { %22 = vsyncpa [#allocation8 + $0x1], 0  ;;  %s2127_s29 = smov 0   ;;  %s2129_s0 = smov 0  }
  0x15   :  { %s2131_s30 = smov 0   ;;  %s2133_s8 = smov 0  }
  0x16   :  { %s2135_s9 = smov 0   ;;  %s2137_s10 = smov 0  }
  0x17 LB: > { %2888 = sst [smem:[#allocation67_spill]] %s2049_s29  ;;  %s1134_s11 = sadd.s32 4294967295, %s2069_s10   ;;  %s2069_s10 = sphi %s2137_s10, %s28_s10   ;;  %s2065_s9 = sphi %s2135_s9, %s2920_s9   ;;  %s2061_s8 = sphi %s2133_s8, %s2916_s8   ;;  %s2057_s30 = sphi %s2131_s30, %s2915_s30   ;;  %s2053_s0 = sphi %s2129_s0, %s2919_s0   ;;  %s2049_s29 = sphi %s2127_s29, %s2918_s29  }
  0x18   : > { %2889 = sst [smem:[#allocation68_spill]] %s2057_s30  ;;  %s1135_s12 = sadd.s32 4294967294, %s2069_s10  }
  0x19   : > { %2890 = sst [smem:[#allocation69_spill]] %s2065_s9  ;;  %s37_s13 = sadd.s32 1, %s2065_s9 }
  0x1a   : > { %2891 = sst [smem:[#allocation70_spill]] %s2069_s10  ;;  %s166_s14 = sadd.s32 1, %s2057_s30 }
  0x1b   : > { %p38_p5 = scmp.ge.s32.totalorder %s37_s13, 2  ;;  %p176_p6 = scmp.ne.s32.totalorder %s2057_s30, %s2053_s0 }
  0x1c   : > { %p177_p7 = scmp.eq.s32.totalorder %s1134_s11, 1  ;;  %p182_p8 = scmp.ne.s32.totalorder %s2053_s0, %s2049_s29 }
  0x1d   : > { %s2922_s13 = smov (%p38_p5, %s37_s13), 0  ;;  %p183_p10 = scmp.eq.s32.totalorder %s1135_s12, 1 }
  0x1e   : > { %2892 = sst [smem:[#allocation71_spill]] %s2922_s13  ;;  %p2167_p9 = por %p177_p7, %p176_p6 }
  0x1f   : > { %s161_s16 = ssub.s32 %s2065_s9, %s2922_s13  ;;  %p1136_p11 = scmp.ge.s32.totalorder %s2069_s10, 1 }
  0x20   : > { %s2893_s15 = scalar_select %p2167_p9, 1, 0 }
  0x21   : > { %p164_p12 = scmp.eq.s32.totalorder %s161_s16, 0  ;;  %p2174_p13 = por %p183_p10, %p182_p8 }
  0x22   : > { %p190_p0 = scmp.lt.s32.totalorder %s2069_s10, 3  ;;  %p2186_p2 = scmp.eq.s32.totalorder %s1134_s11, 0 }
  0x23   : > { %s2894_s17 = scalar_select %p2174_p13, 1, 0 }
  0x24   : > { %s2180_s18 = scalar_select %p164_p12, %s2057_s30, %s166_s14  }
  0x25   : > { %2895 = sst [smem:[#allocation72_spill]] %s2894_s17  ;;  %p2182_p1 = pnand %p1136_p11, %p190_p0 }
  0x26   : > { %2896 = sst [smem:[#allocation73_spill]] %s2180_s18  ;;  %s2072_s21 = smov [#allocation6]  }
  0x27   : > { %s2897_s19 = scalar_select %p2182_p1, 1, 0 }
  0x28   : > { %s2898_s20 = scalar_select %p2186_p2, 1, 0 }
  0x29   : > { %p1417_p3 = pneg %p2182_p1  ;;  %s205_s22 = sshll.u32 %s2072_s21, 4  ;;  %s206_s22 = int_to_ptr.vmem [resolvable:$true] %s205_s22 }
  0x2a   : > { %s2073_s23 = smov [#allocation9]   ;;  %s1524_s26 = scalar_lea.vmem %s206_s22, 128 }
  0x2b   : > { %s215_s24 = sshll.u32 %s2073_s23, 4  ;;  %p2194_p4 = pnand %p2186_p2, %p1417_p3  ;;  %s216_s24 = int_to_ptr.vmem [resolvable:$true] %s215_s24 }
  0x2c   : > { %p1525_p6 = scmp.ne.s32.totalorder %s206_s22, %s1524_s26  ;;  %p1532_p10 = scmp.lt.s32.totalorder %s206_s22, %s206_s22 }
  0x2d   : > { %p1515_p5 = pneg %p2194_p4  ;;  %p1533_p11 = scmp.lt.s32.totalorder %s1524_s26, %s1524_s26 }
  0x2f   : > { %p1527_p7 = pnand %p1525_p6, %p1515_p5  ;;  %p1534_p12 = por %p1533_p11, %p1532_p10 }
  0x31   : > { %p1528_p8 = pneg %p1527_p7 }
  0x33   : > { %p1535_p0 = pnand %p1534_p12, %p1528_p8 }
  0x35   : > { %1538 = shalt.err (!%p1535_p0)
}
  0x36   : > { %s2900_s2 = sld [smem:[#allocation75_spill]]  ;;  %s1550_s11 = scalar_lea.vmem %s216_s24, 512 }
  0x37   : > { %p1551_p3 = scmp.ne.s32.totalorder %s216_s24, %s1550_s11  ;;  %p1558_p6 = scmp.lt.s32.totalorder %s216_s24, %s216_s24 }
  0x38   : > { %p1559_p7 = scmp.lt.s32.totalorder %s1550_s11, %s1550_s11 }
  0x39   : > { %p1553_p13 = pnand %p1551_p3, %p1515_p5 }
  0x3a   : > { %p1560_p2 = por %p1559_p7, %p1558_p6 }
  0x3b   : > { %p1554_p9 = pneg %p1553_p13 }
  0x3c   : > { %1420 = dma.hbm_to_vmem [thread:$0]  (!%p2194_p4), %s2900_s2, 128, %s206_s22, [#allocation7]  }
  0x3d   : > { %p1561_p1 = pnand %p1560_p2, %p1554_p9 }
  0x3f   : > { %1564 = shalt.err (!%p1561_p1)
}
  0x40   : > { %s2074_s12 = smov 128   ;;  %s2075_s14 = smov 8  }
  0x41   : > { %s2901_s3 = sld [smem:[#allocation76_spill]]  ;;  %p2902_p8 = scmp.ne.s32.totalorder %s2897_s19, 0 }
  0x42   : > { %p2903_p10 = scmp.ne.s32.totalorder (!%p2902_p8), %s2898_s20, 0 }
  0x43   : > { %247 = sbr.rel (%p2902_p8) target bundleno = 927 (0x39f), region = 40 }
  0x47   : > { %1423 = dma.hbm_to_vmem [thread:$0]  (!%p2194_p4), %s2901_s3, 512, %s216_s24, [#allocation10], %s2074_s12, %s2074_s12, %s2075_s14  }
  0x48   : > { %2034 = dma.done.wait (%p2903_p10), [#allocation7], 128  }
  0x49   : > { %2036 = vsyncadd (%p2903_p10), [#allocation7], 4294967168 }
  0x4a   : > { %2038 = dma.done.wait (%p2903_p10), [#allocation10], 512  }
  0x4b   : > { %2040 = vsyncadd (%p2903_p10), [#allocation10], 4294966784  ;;  %p281_p9 = scmp.lt.s32.totalorder %s2061_s8, 1  ;;  %v2076_v0 = vmov 0   ;;  %v2077_v1 = vmov 2   ;;  %v2078_v2 = vmov 0.0  }
  0x4c   : > { %1494 = vset.pattern.permute.xlu0 %v2076_v0  ;;  %1496 = vset.pattern.permute.xlu1 %v2077_v1  ;;  %s2904_s1 = sld [smem:[#allocation74_spill]]  ;;  %v2232_v3 = vld [vmem:[#allocation6] sm:$0xff]  ;;  %vm816_vm0 = vcmask 1045504   ;;  %v810_v6 = vld [vmem:[#allocation9 + $0x10] sm:$0xff]  ;;  %v2079_v7 = vmov 1   ;;  %v2080_v8 = vmov 3  }
  0x4d   : > { %s282_s19 = scalar_select %p281_p9, %s2061_s8, 1  ;;  %1346 = vmatprep.subr.mxu0 %v2078_v2  ;;  %v811_v5 = vld [vmem:[#allocation9 + $0x18] sm:$0x3f]  ;;  %v809_v9 = vld [vmem:[#allocation9 + $0x8] sm:$0xff]  ;;  %v808_v10 = vld [vmem:[#allocation9] sm:$0xff]  ;;  %vm2081_vm1 = vmmov 0  }
  0x4e   : > { %1347 = vmatpush3.msk.msra.mxu0 %vm816_vm0, %v811_v5  ;;  %1354 = vmatprep.mubr.msk.f32.mxu0 %vm2081_vm1, %v2078_v2  ;;  %s2875_s20 = sand.u32 1, %s2053_s0   ;;  %p288_p13 = scmp.lt.s32.totalorder %s2061_s8, 0 }
  0x4f   : > { %s1144_s22 = sshll.u32 %s282_s19, 3  ;;  %1348 = vmatprep.subr.mxu0 %v2078_v2  ;;  %s2242_s26 = sshll.u32 %s2875_s20, 3 }
  0x50   : > { %1349 = vmatpush3.msra.mxu0 %v810_v6  ;;  %s289_s27 = ssub.s32 0, %s2061_s8  ;;  %p1432_p1 = scmp.eq.s32.totalorder %s2061_s8, 0 }
  0x51   : > { %1350 = vmatprep.subr.mxu0 %v2078_v2  ;;  %s1145_s28 = smin.u32 %s2061_s8, %s289_s27  ;;  %s2248_s14 = sshll.u32 %s2061_s8, 7 }
  0x52   : > { %s287_s25 = scalar_lea.vmem %s2904_s1, %s1144_s22  ;;  %1351 = vmatpush3.msra.mxu0 %v809_v9  ;;  %s291_s11 = sand.u32 1, %s1145_s28  }
  0x53   : > { %v778_v4 = vld [vmem:[%s287_s25] sm:$0xff]  ;;  %1352 = vmatprep.subr.mxu0 %v2078_v2  ;;  %s292_s12 = ssub.s32 0, %s291_s11  ;;  %s342_s24 = sadd.s32 1, %s2248_s14 }
  0x54   : > { %782 = vperm.xlu0 %1494, %v778_v4   ;;  %795 = vperm.xlu1 %1496, %v778_v4   ;;  %s2924_s12 = smov (!%p288_p13, %s292_s12), %s291_s11  ;;  %s2928_s24 = smov (!%p1432_p1, %s342_s24), 0 }
  0x55   : > { %1353 = vmatpush3.msra.mxu0 %v808_v10  ;;  %s1366_s16 = scalar_select %p1432_p1, [#allocation5], [#allocation46] }
  0x56   : > { %p1147_p2 = scmp.lt.s32.totalorder %s2924_s12, 0  ;;  %s298_s21 = sadd.s32 2, %s2924_s12 }
  0x57   : > { %s1367_s19 = scalar_select %p1432_p1, %s2248_s14, 0 }
  0x58   : > { %1495 = vset.pattern.permute.xlu0 %v2079_v7  ;;  %1497 = vset.pattern.permute.xlu1 %v2080_v8  ;;  %s2926_s21 = smov (!%p1147_p2, %s298_s21), %s2924_s12 }
  0x59   : > { %788 = vperm.xlu0 %1495, %v778_v4   ;;  %802 = vperm.xlu1 %1497, %v778_v4   ;;  %s313_s22 = sld [smem:[%s1366_s16 + %s1367_s19]]  ;;  %s1156_s23 = sshll.u32 %s2926_s21, 3 }
  0x5a   : > { %s2259_s25 = scalar_lea.vmem [#allocation2], %s1156_s23  ;;  %s2285_s9 = scalar_lea.sflag [#allocation3], %s2926_s21 }
  0x5b   : > { %s331_s27 = sshll.u32 %s2259_s25, 4  ;;  %s1004_s11 = scalar_lea.vmem %s2259_s25, 1 [#allocation2]  ;;  %s2263_s27 = int_to_ptr.vmem [resolvable:$true] %s331_s27 }
  0x5c   : > { %s1369_s20 = scalar_select %p1432_p1, [#allocation5], [#allocation47] }
  0x5d   : > { %1498 = vset.pattern.permute.xlu0 %v2080_v8  ;;  %s2272_s16 = sshll.u32 %s1004_s11, 4  ;;  %s1009_s28 = scalar_lea.vmem %s2259_s25, 2 [#allocation2]  ;;  %s361_s16 = int_to_ptr.vmem [resolvable:$true] %s2272_s16 }
  0x5e   : > { %s2270_s12 = sld [smem:[%s1369_s20 + %s2928_s24]]  ;;  %s2282_s13 = sshll.u32 %s1009_s28, 4  ;;  %s2326_s13 = int_to_ptr.vmem [resolvable:$true] %s2282_s13 }
  0x5f   : > { %p314_p4 = scmp.gt.s32.totalorder %s313_s22, 0  ;;  %p1150_p5 = scmp.lt.s32.totalorder %s313_s22, 63 }
  0x60   : > { %s2276_s19 = scalar_select %p1432_p1, [#allocation5], [#allocation48] }
  0x61   : > { %s2930_s22 = smov (!%p314_p4, %s313_s22), 0  ;;  %s2292_s11 = scalar_lea.hbm %s2869_s6, 1024 }
  0x62   : > { %s2932_s22 = smov (!%p1150_p5, %s2930_s22), 63 }
  0x63   : > { %s1155_s23 = sshll.u32 %s2932_s22, 4 }
  0x64   : > { %s319_s3 = scalar_lea.hbm %s2869_s6, %s1155_s23 }
  0x65   : > { %s1565_s18 = scalar_lea.hbm %s319_s3, 16  ;;  %p1570_p3 = scmp.lt.s32.totalorder %s319_s3, %s2869_s6 }
  0x66   : > { %p1566_p11 = scmp.ne.s32.totalorder %s319_s3, %s1565_s18  ;;  %p1571_p6 = scmp.lt.s32.totalorder %s2292_s11, %s1565_s18 }
  0x68   : > { %p1567_p12 = pnand %p1566_p11, %p1432_p1  ;;  %p1572_p7 = por %p1571_p6, %p1570_p3 }
  0x6a   : > { %p1568_p0 = pneg %p1567_p12 }
  0x6c   : > { %p1573_p8 = pnand %p1572_p7, %p1568_p0 }
  0x6e   : > { %1576 = shalt.err (!%p1573_p8)  }
  0x6f   : > { %s1577_s1 = scalar_lea.vmem %s2263_s27, 16  ;;  %s2082_s2 = smov [#allocation2]  }
  0x70   : > { %p1578_p10 = scmp.ne.s32.totalorder %s2263_s27, %s1577_s1  ;;  %s1581_s28 = sshll.u32 %s2082_s2, 4  ;;  %s2302_s28 = int_to_ptr.vmem [resolvable:$false] %s1581_s28 }
  0x71   : > { %s2305_s30 = scalar_lea.vmem %s2302_s28, 256  ;;  %p1584_p2 = scmp.lt.s32.totalorder %s2263_s27, %s2302_s28 }
  0x72   : > { %p1579_p9 = pnand %p1578_p10, %p1432_p1  ;;  %p1585_p4 = scmp.lt.s32.totalorder %s2305_s30, %s1577_s1 }
  0x74   : > { %p1580_p13 = pneg %p1579_p9  ;;  %p1586_p5 = por %p1585_p4, %p1584_p2 }
  0x76   : > { %p1587_p11 = pnand %p1586_p5, %p1580_p13 }
  0x78   : > { %1590 = shalt.err (!%p1587_p11)  }
  0x79   : > { %1368 = dma.hbm_to_vmem [thread:$0]  (%p1432_p1), %s319_s3, 16, %s2263_s27, %s2285_s9 }
  0x7a   : > { %p344_p12 = scmp.gt.s32.totalorder %s2270_s12, 0  ;;  %p1158_p0 = scmp.lt.s32.totalorder %s2270_s12, 63 }
  0x7b   : > { %s2905_s18 = sadd.s32 2, %s2248_s14  ;;  %s1014_s20 = scalar_lea.vmem %s2259_s25, 3 [#allocation2] }
  0x7c   : > { %s2934_s18 = smov (!%p1432_p1, %s2905_s18), 0  ;;  %s2936_s12 = smov (!%p344_p12, %s2270_s12), 0 }
  0x7d   : > { %s2323_s23 = sld [smem:[%s2276_s19 + %s2934_s18]]  ;;  %s2938_s12 = smov (!%p1158_p0, %s2936_s12), 63 }
  0x7e   : > { %s1163_s24 = sshll.u32 %s2938_s12, 4  ;;  %s400_s22 = sadd.s32 3, %s2248_s14 }
  0x7f   : > { %s350_s3 = scalar_lea.hbm %s2869_s6, %s1163_s24  ;;  %s2333_s27 = sshll.u32 %s1014_s20, 4  ;;  %s2386_s27 = int_to_ptr.vmem [resolvable:$true] %s2333_s27 }
  0x80   : > { %s1591_s17 = scalar_lea.hbm %s350_s3, 16  ;;  %p1596_p8 = scmp.lt.s32.totalorder %s350_s3, %s2869_s6 }
  0x81   : > { %p1592_p3 = scmp.ne.s32.totalorder %s350_s3, %s1591_s17  ;;  %p1597_p10 = scmp.lt.s32.totalorder %s2292_s11, %s1591_s17 }
  0x83   : > { %p1593_p6 = pnand %p1592_p3, %p1432_p1  ;;  %p1598_p9 = por %p1597_p10, %p1596_p8 }
  0x85   : > { %p1594_p7 = pneg %p1593_p6 }
  0x87   : > { %p1599_p13 = pnand %p1598_p9, %p1594_p7 }
  0x89   : > { %1602 = shalt.err (!%p1599_p13)  }
  0x8a   : > { %s1603_s12 = scalar_lea.vmem %s361_s16, 16  ;;  %p1610_p11 = scmp.lt.s32.totalorder %s361_s16, %s2302_s28 }
  0x8b   : > { %p1604_p2 = scmp.ne.s32.totalorder %s361_s16, %s1603_s12  ;;  %p1611_p12 = scmp.lt.s32.totalorder %s2305_s30, %s1603_s12 }
  0x8d   : > { %p1605_p4 = pnand %p1604_p2, %p1432_p1  ;;  %p1612_p0 = por %p1611_p12, %p1610_p11 }
  0x8f   : > { %p1606_p5 = pneg %p1605_p4 }
  0x91   : > { %p1613_p3 = pnand %p1612_p0, %p1606_p5 }
  0x93   : > { %1616 = shalt.err (!%p1613_p3)  }
  0x94   : > { %1371 = dma.hbm_to_vmem [thread:$0]  (%p1432_p1), %s350_s3, 16, %s361_s16, %s2285_s9 }
  0x95   : > { %p373_p6 = scmp.gt.s32.totalorder %s2323_s23, 0  ;;  %p1166_p7 = scmp.lt.s32.totalorder %s2323_s23, 63 }
  0x96   : > { %s1375_s29 = scalar_select %p1432_p1, [#allocation5], [#allocation49] }
  0x97   : > { %s2940_s23 = smov (!%p373_p6, %s2323_s23), 0  ;;  %s2942_s22 = smov (!%p1432_p1, %s400_s22), 0 }
  0x98   : > { %s2944_s23 = smov (!%p1166_p7, %s2940_s23), 63  ;;  %s2355_s17 = sld [smem:[%s1375_s29 + %s2942_s22]] }
  0x99   : > { %s429_s18 = sadd.s32 4, %s2248_s14  ;;  %s1171_s20 = sshll.u32 %s2944_s23, 4 }
  0x9a   : > { %s1019_s24 = scalar_lea.vmem %s2259_s25, 4 [#allocation2]  ;;  %s379_s19 = scalar_lea.hbm %s2869_s6, %s1171_s20 }
  0x9b   : > { %s447_s12 = sshll.u32 %s1019_s24, 4  ;;  %s1617_s16 = scalar_lea.hbm %s379_s19, 16  ;;  %s2391_s12 = int_to_ptr.vmem [resolvable:$true] %s447_s12 }
  0x9c   : > { %p1618_p8 = scmp.ne.s32.totalorder %s379_s19, %s1617_s16  ;;  %p1622_p13 = scmp.lt.s32.totalorder %s379_s19, %s2869_s6 }
  0x9d   : > { %p1623_p2 = scmp.lt.s32.totalorder %s2292_s11, %s1617_s16 }
  0x9e   : > { %p1619_p10 = pnand %p1618_p8, %p1432_p1 }
  0x9f   : > { %p1624_p4 = por %p1623_p2, %p1622_p13 }
  0xa0   : > { %p1620_p9 = pneg %p1619_p10 }
  0xa2   : > { %p1625_p5 = pnand %p1624_p4, %p1620_p9 }
  0xa4   : > { %1628 = shalt.err (!%p1625_p5)  }
  0xa5   : > { %s1629_s23 = scalar_lea.vmem %s2326_s13, 16  ;;  %p1636_p3 = scmp.lt.s32.totalorder %s2326_s13, %s2302_s28 }
  0xa6   : > { %p1630_p11 = scmp.ne.s32.totalorder %s2326_s13, %s1629_s23  ;;  %p1637_p6 = scmp.lt.s32.totalorder %s2305_s30, %s1629_s23 }
  0xa8   : > { %p1631_p12 = pnand %p1630_p11, %p1432_p1  ;;  %p1638_p7 = por %p1637_p6, %p1636_p3 }
  0xaa   : > { %p1632_p0 = pneg %p1631_p12 }
  0xac   : > { %p1639_p8 = pnand %p1638_p7, %p1632_p0 }
  0xae   : > { %1642 = shalt.err (!%p1639_p8)  }
  0xaf   : > { %1374 = dma.hbm_to_vmem [thread:$0]  (%p1432_p1), %s379_s19, 16, %s2326_s13, %s2285_s9 }
  0xb0   : > { %s1378_s10 = scalar_select %p1432_p1, [#allocation5], [#allocation50] }
  0xb1   : > { %s2946_s18 = smov (!%p1432_p1, %s429_s18), 0  ;;  %p402_p10 = scmp.gt.s32.totalorder %s2355_s17, 0 }
  0xb2   : > { %p1174_p9 = scmp.lt.s32.totalorder %s2355_s17, 63  ;;  %s2388_s22 = sld [smem:[%s1378_s10 + %s2946_s18]] }
  0xb3   : > { %s2948_s17 = smov (!%p402_p10, %s2355_s17), 0  ;;  %s458_s29 = sadd.s32 5, %s2248_s14 }
  0xb4   : > { %s2950_s17 = smov (!%p1174_p9, %s2948_s17), 63  ;;  %s1024_s24 = scalar_lea.vmem %s2259_s25, 5 [#allocation2] }
  0xb5   : > { %s2396_s13 = scalar_select %p1432_p1, [#allocation5], [#allocation51] }
  0xb6   : > { %s1179_s20 = sshll.u32 %s2950_s17, 4 }
  0xb7   : > { %s408_s19 = scalar_lea.hbm %s2869_s6, %s1179_s20 }
  0xb8   : > { %p431_p13 = scmp.gt.s32.totalorder %s2388_s22, 0  ;;  %s1643_s16 = scalar_lea.hbm %s408_s19, 16 }
  0xb9   : > { %p1644_p2 = scmp.ne.s32.totalorder %s408_s19, %s1643_s16  ;;  %p1648_p11 = scmp.lt.s32.totalorder %s408_s19, %s2869_s6 }
  0xba   : > { %p1649_p12 = scmp.lt.s32.totalorder %s2292_s11, %s1643_s16 }
  0xbb   : > { %p1645_p4 = pnand %p1644_p2, %p1432_p1 }
  0xbc   : > { %p1650_p0 = por %p1649_p12, %p1648_p11 }
  0xbd   : > { %p1646_p5 = pneg %p1645_p4 }
  0xbf   : > { %p1651_p3 = pnand %p1650_p0, %p1646_p5 }
  0xc1   : > { %1654 = shalt.err (!%p1651_p3)  }
  0xc2   : > { %s1655_s17 = scalar_lea.vmem %s2386_s27, 16  ;;  %p1662_p10 = scmp.lt.s32.totalorder %s2386_s27, %s2302_s28 }
  0xc3   : > { %p1656_p6 = scmp.ne.s32.totalorder %s2386_s27, %s1655_s17  ;;  %p1663_p9 = scmp.lt.s32.totalorder %s2305_s30, %s1655_s17 }
  0xc5   : > { %p1657_p7 = pnand %p1656_p6, %p1432_p1  ;;  %p1664_p2 = por %p1663_p9, %p1662_p10 }
  0xc7   : > { %p1658_p8 = pneg %p1657_p7 }
  0xc9   : > { %p1665_p4 = pnand %p1664_p2, %p1658_p8 }
  0xcb   : > { %1668 = shalt.err (!%p1665_p4)  }
  0xcc   : > { %1377 = dma.hbm_to_vmem [thread:$0]  (%p1432_p1), %s408_s19, 16, %s2386_s27, %s2285_s9 }
  0xcd   : > { %s432_s23 = scalar_select %p431_p13, %s2388_s22, 0 }
  0xce   : > { %p1182_p5 = scmp.lt.s32.totalorder %s2388_s22, 63  ;;  %s2424_s10 = sshll.u32 %s1024_s24, 4  ;;  %s2460_s10 = int_to_ptr.vmem [resolvable:$true] %s2424_s10 }
  0xcf   : > { %s2952_s29 = smov (!%p1432_p1, %s458_s29), 0  ;;  %s487_s1 = sadd.s32 6, %s2248_s14 }
  0xd0   : > { %s2954_s23 = smov (!%p1182_p5, %s432_s23), 63  ;;  %s2429_s20 = sld [smem:[%s2396_s13 + %s2952_s29]] }
  0xd1   : > { %s1187_s2 = sshll.u32 %s2954_s23, 4  ;;  %s1029_s16 = scalar_lea.vmem %s2259_s25, 6 [#allocation2] }
  0xd2   : > { %s437_s17 = scalar_lea.hbm %s2869_s6, %s1187_s2  ;;  %s505_s7 = sshll.u32 %s1029_s16, 4  ;;  %s2465_s7 = int_to_ptr.vmem [resolvable:$true] %s505_s7 }
  0xd3   : > { %s1669_s27 = scalar_lea.hbm %s437_s17, 16  ;;  %p1674_p0 = scmp.lt.s32.totalorder %s437_s17, %s2869_s6 }
  0xd4   : > { %p1670_p11 = scmp.ne.s32.totalorder %s437_s17, %s1669_s27  ;;  %p1675_p3 = scmp.lt.s32.totalorder %s2292_s11, %s1669_s27 }
  0xd6   : > { %p1671_p13 = pnand %p1670_p11, %p1432_p1  ;;  %p1676_p6 = por %p1675_p3, %p1674_p0 }
  0xd8   : > { %p1672_p12 = pneg %p1671_p13 }
  0xda   : > { %p1677_p7 = pnand %p1676_p6, %p1672_p12 }
  0xdc   : > { %1680 = shalt.err (!%p1677_p7)  }
  0xdd   : > { %s1681_s29 = scalar_lea.vmem %s2391_s12, 16  ;;  %p1688_p2 = scmp.lt.s32.totalorder %s2391_s12, %s2302_s28 }
  0xde   : > { %p1682_p8 = scmp.ne.s32.totalorder %s2391_s12, %s1681_s29  ;;  %p1689_p4 = scmp.lt.s32.totalorder %s2305_s30, %s1681_s29 }
  0xe0   : > { %p1683_p10 = pnand %p1682_p8, %p1432_p1  ;;  %p1690_p5 = por %p1689_p4, %p1688_p2 }
  0xe2   : > { %p1684_p9 = pneg %p1683_p10 }
  0xe4   : > { %p1691_p11 = pnand %p1690_p5, %p1684_p9 }
  0xe6   : > { %1694 = shalt.err (!%p1691_p11)  }
  0xe7   : > { %1380 = dma.hbm_to_vmem [thread:$0]  (%p1432_p1), %s437_s17, 16, %s2391_s12, %s2285_s9 }
  0xe8   : > { %s1384_s13 = scalar_select %p1432_p1, [#allocation5], [#allocation52] }
  0xe9   : > { %s2956_s1 = smov (!%p1432_p1, %s487_s1), 0  ;;  %p460_p13 = scmp.gt.s32.totalorder %s2429_s20, 0 }
  0xea   : > { %p1190_p12 = scmp.lt.s32.totalorder %s2429_s20, 63  ;;  %s2462_s19 = sld [smem:[%s1384_s13 + %s2956_s1]] }
  0xeb   : > { %s2958_s20 = smov (!%p460_p13, %s2429_s20), 0  ;;  %s516_s23 = sadd.s32 7, %s2248_s14 }
  0xec   : > { %s2960_s20 = smov (!%p1190_p12, %s2958_s20), 63  ;;  %s1034_s16 = scalar_lea.vmem %s2259_s25, 7 [#allocation2] }
  0xed   : > { %s2470_s12 = scalar_select %p1432_p1, [#allocation5], [#allocation53] }
  0xee   : > { %s1195_s2 = sshll.u32 %s2960_s20, 4 }
  0xef   : > { %s466_s17 = scalar_lea.hbm %s2869_s6, %s1195_s2 }
  0xf0   : > { %p489_p0 = scmp.gt.s32.totalorder %s2462_s19, 0  ;;  %s1695_s27 = scalar_lea.hbm %s466_s17, 16 }
  0xf1   : > { %p1696_p3 = scmp.ne.s32.totalorder %s466_s17, %s1695_s27  ;;  %p1700_p8 = scmp.lt.s32.totalorder %s466_s17, %s2869_s6 }
  0xf2   : > { %p1701_p10 = scmp.lt.s32.totalorder %s2292_s11, %s1695_s27 }
  0xf3   : > { %p1697_p6 = pnand %p1696_p3, %p1432_p1 }
  0xf4   : > { %p1702_p9 = por %p1701_p10, %p1700_p8 }
  0xf5   : > { %p1698_p7 = pneg %p1697_p6 }
  0xf7   : > { %p1703_p2 = pnand %p1702_p9, %p1698_p7 }
  0xf9   : > { %1706 = shalt.err (!%p1703_p2)  }
  0xfa   : > { %s1707_s20 = scalar_lea.vmem %s2460_s10, 16  ;;  %p1714_p13 = scmp.lt.s32.totalorder %s2460_s10, %s2302_s28 }
  0xfb   : > { %p1708_p4 = scmp.ne.s32.totalorder %s2460_s10, %s1707_s20  ;;  %p1715_p12 = scmp.lt.s32.totalorder %s2305_s30, %s1707_s20 }
  0xfd   : > { %p1709_p5 = pnand %p1708_p4, %p1432_p1  ;;  %p1716_p3 = por %p1715_p12, %p1714_p13 }
  0xff   : > { %p1710_p11 = pneg %p1709_p5 }
 0x101   : > { %p1717_p6 = pnand %p1716_p3, %p1710_p11 }
 0x103   : > { %1720 = shalt.err (!%p1717_p6)  }
 0x104   : > { %1383 = dma.hbm_to_vmem [thread:$0]  (%p1432_p1), %s466_s17, 16, %s2460_s10, %s2285_s9 }
 0x105   : > { %s490_s24 = scalar_select %p489_p0, %s2462_s19, 0 }
 0x106   : > { %p1198_p7 = scmp.lt.s32.totalorder %s2462_s19, 63  ;;  %s2498_s29 = sshll.u32 %s1034_s16, 4  ;;  %s535_s29 = int_to_ptr.vmem [resolvable:$true] %s2498_s29 }
 0x107   : > { %s2962_s23 = smov (!%p1432_p1, %s516_s23), 0  ;;  %s538_s2 = sadd.s32 1, %s2061_s8 }
 0x108   : > { %s2964_s24 = smov (!%p1198_p7, %s490_s24), 63  ;;  %s2503_s13 = sld [smem:[%s2470_s12 + %s2962_s23]] }
 0x109   : > { %s1203_s18 = sshll.u32 %s2964_s24, 4  ;;  %p2509_p8 = scmp.lt.s32.totalorder %s538_s2, 2 }
 0x10a   : > { %s495_s1 = scalar_lea.hbm %s2869_s6, %s1203_s18 }
 0x10b   : > { %s1721_s10 = scalar_lea.hbm %s495_s1, 16  ;;  %p1726_p2 = scmp.lt.s32.totalorder %s495_s1, %s2869_s6 }
 0x10c   : > { %p1722_p0 = scmp.ne.s32.totalorder %s495_s1, %s1721_s10  ;;  %p1727_p4 = scmp.lt.s32.totalorder %s2292_s11, %s1721_s10 }
 0x10e   : > { %p1723_p10 = pnand %p1722_p0, %p1432_p1  ;;  %p1728_p5 = por %p1727_p4, %p1726_p2 }
 0x110   : > { %p1724_p9 = pneg %p1723_p10 }
 0x112   : > { %p1729_p11 = pnand %p1728_p5, %p1724_p9 }
 0x114   : > { %1732 = shalt.err (!%p1729_p11)  }
 0x115   : > { %s1733_s23 = scalar_lea.vmem %s2465_s7, 16  ;;  %p1740_p6 = scmp.lt.s32.totalorder %s2465_s7, %s2302_s28 }
 0x116   : > { %p1734_p13 = scmp.ne.s32.totalorder %s2465_s7, %s1733_s23  ;;  %p1741_p7 = scmp.lt.s32.totalorder %s2305_s30, %s1733_s23 }
 0x118   : > { %p1735_p12 = pnand %p1734_p13, %p1432_p1  ;;  %p1742_p0 = por %p1741_p7, %p1740_p6 }
 0x11a   : > { %p1736_p3 = pneg %p1735_p12 }
 0x11c   : > { %p1743_p10 = pnand %p1742_p0, %p1736_p3 }
 0x11e   : > { %1746 = shalt.err (!%p1743_p10)  }
 0x11f   : > { %1386 = dma.hbm_to_vmem [thread:$0]  (%p1432_p1), %s495_s1, 16, %s2465_s7, %s2285_s9 }
 0x120   : > { %s543_s12 = ssub.s32 1, %s2926_s21  ;;  %s2532_s17 = sadd.s32 128, %s2248_s14 }
 0x121   : > { %s1391_s20 = scalar_select %p2509_p8, [#allocation5], [#allocation54] }
 0x122   : > { %p518_p9 = scmp.gt.s32.totalorder %s2503_s13, 0  ;;  %p1206_p2 = scmp.lt.s32.totalorder %s2503_s13, 63 }
 0x123   : > { %s1392_s24 = scalar_select %p2509_p8, %s2532_s17, 0 }
 0x124   : > { %s2966_s13 = smov (!%p518_p9, %s2503_s13), 0  ;;  %s1221_s18 = sshll.u32 %s543_s12, 3 }
 0x125   : > { %s2542_s2 = sld [smem:[%s1391_s20 + %s1392_s24]]  ;;  %s2968_s13 = smov (!%p1206_p2, %s2966_s13), 63 }
 0x126   : > { %s1211_s7 = sshll.u32 %s2968_s13, 4  ;;  %s2550_s10 = scalar_lea.vmem [#allocation2], %s1221_s18 }
 0x127   : > { %s524_s1 = scalar_lea.hbm %s2869_s6, %s1211_s7  ;;  %s570_s19 = sshll.u32 %s2550_s10, 4  ;;  %s2568_s19 = int_to_ptr.vmem [resolvable:$true] %s570_s19 }
 0x128   : > { %s1747_s16 = scalar_lea.hbm %s524_s1, 16  ;;  %p1752_p13 = scmp.lt.s32.totalorder %s524_s1, %s2869_s6 }
 0x129   : > { %p1748_p4 = scmp.ne.s32.totalorder %s524_s1, %s1747_s16  ;;  %p1753_p12 = scmp.lt.s32.totalorder %s2292_s11, %s1747_s16 }
 0x12b   : > { %p1749_p5 = pnand %p1748_p4, %p1432_p1  ;;  %p1754_p3 = por %p1753_p12, %p1752_p13 }
 0x12d   : > { %p1750_p11 = pneg %p1749_p5 }
 0x12f   : > { %p1755_p6 = pnand %p1754_p3, %p1750_p11 }
 0x131   : > { %1758 = shalt.err (!%p1755_p6)  }
 0x132   : > { %s1759_s13 = scalar_lea.vmem %s535_s29, 16  ;;  %p1766_p9 = scmp.lt.s32.totalorder %s535_s29, %s2302_s28 }
 0x133   : > { %p1760_p7 = scmp.ne.s32.totalorder %s535_s29, %s1759_s13  ;;  %p1767_p2 = scmp.lt.s32.totalorder %s2305_s30, %s1759_s13 }
 0x135   : > { %p1761_p0 = pnand %p1760_p7, %p1432_p1  ;;  %p1768_p4 = por %p1767_p2, %p1766_p9 }
 0x137   : > { %p1762_p10 = pneg %p1761_p0 }
 0x139   : > { %p1769_p5 = pnand %p1768_p4, %p1762_p10 }
 0x13b   : > { %1772 = shalt.err (!%p1769_p5)  }
 0x13c   : > { %1389 = dma.hbm_to_vmem [thread:$0]  (%p1432_p1), %s524_s1, 16, %s535_s29, %s2285_s9 }
 0x13d   : > { %p553_p11 = scmp.gt.s32.totalorder %s2542_s2, 0  ;;  %p1215_p13 = scmp.lt.s32.totalorder %s2542_s2, 63 }
 0x13e   : > { %s581_s24 = sadd.s32 1, %s2532_s17  ;;  %s1044_s7 = scalar_lea.vmem %s2550_s10, 1 [#allocation2] }
 0x13f   : > { %s2970_s2 = smov (!%p553_p11, %s2542_s2), 0  ;;  %s2974_s24 = smov (!%p2509_p8, %s581_s24), 0 }
 0x140   : > { %s1394_s8 = scalar_select %p2509_p8, [#allocation5], [#allocation55] }
 0x141   : > { %s2972_s2 = smov (!%p1215_p13, %s2970_s2), 63  ;;  %s2584_s1 = scalar_lea.sflag [#allocation3], %s543_s12 }
 0x142   : > { %s1220_s18 = sshll.u32 %s2972_s2, 4  ;;  %s2580_s29 = sld [smem:[%s1394_s8 + %s2974_s24]] }
 0x143   : > { %s558_s16 = scalar_lea.hbm %s2869_s6, %s1220_s18 }
 0x144   : > { %s1773_s23 = scalar_lea.hbm %s558_s16, 16  ;;  %p1778_p6 = scmp.lt.s32.totalorder %s558_s16, %s2869_s6 }
 0x145   : > { %p1774_p1 = scmp.ne.s32.totalorder %s558_s16, %s1773_s23  ;;  %p1779_p7 = scmp.lt.s32.totalorder %s2292_s11, %s1773_s23 }
 0x147   : > { %p1775_p12 = pnand %p1774_p1, %p2509_p8  ;;  %p1780_p0 = por %p1779_p7, %p1778_p6 }
 0x149   : > { %p1776_p3 = pneg %p1775_p12 }
 0x14b   : > { %p1781_p10 = pnand %p1780_p0, %p1776_p3 }
 0x14d   : > { %1784 = shalt.err (!%p1781_p10)  }
 0x14e   : > { %s1785_s21 = scalar_lea.vmem %s2568_s19, 16  ;;  %p1792_p5 = scmp.lt.s32.totalorder %s2568_s19, %s2302_s28 }
 0x14f   : > { %p1786_p9 = scmp.ne.s32.totalorder %s2568_s19, %s1785_s21  ;;  %p1793_p11 = scmp.lt.s32.totalorder %s2305_s30, %s1785_s21 }
 0x151   : > { %p1787_p2 = pnand %p1786_p9, %p2509_p8  ;;  %p1794_p13 = por %p1793_p11, %p1792_p5 }
 0x153   : > { %p1788_p4 = pneg %p1787_p2 }
 0x155   : > { %p1795_p1 = pnand %p1794_p13, %p1788_p4 }
 0x157   : > { %1798 = shalt.err (!%p1795_p1)  }
 0x158   : > { %1393 = dma.hbm_to_vmem [thread:$0]  (%p2509_p8), %s558_s16, 16, %s2568_s19, %s2584_s1  ;;  %v779_v11 = vlaneseq }
 0x159   : > { %s599_s12 = sshll.u32 %s1044_s7, 4  ;;  %s610_s2 = sadd.s32 2, %s2532_s17  ;;  %s2610_s12 = int_to_ptr.vmem [resolvable:$true] %s599_s12 }
 0x15a   : > { %s1397_s24 = scalar_select %p2509_p8, [#allocation5], [#allocation56] }
 0x15b   : > { %s2976_s2 = smov (!%p2509_p8, %s610_s2), 0  ;;  %p583_p12 = scmp.gt.s32.totalorder %s2580_s29, 0 }
 0x15c   : > { %p1223_p3 = scmp.lt.s32.totalorder %s2580_s29, 63  ;;  %s2612_s8 = sld [smem:[%s1397_s24 + %s2976_s2]] }
 0x15d   : > { %s2978_s29 = smov (!%p583_p12, %s2580_s29), 0  ;;  %s1049_s18 = scalar_lea.vmem %s2550_s10, 2 [#allocation2] }
 0x15e   : > { %s639_s3 = sadd.s32 3, %s2532_s17  ;;  %s2980_s29 = smov (!%p1223_p3, %s2978_s29), 63 }
 0x15f   : > { %s1400_s19 = scalar_select %p2509_p8, [#allocation5], [#allocation57] }
 0x160   : > { %s1228_s7 = sshll.u32 %s2980_s29, 4  ;;  %s2619_s27 = sshll.u32 %s1049_s18, 4  ;;  %s2652_s27 = int_to_ptr.vmem [resolvable:$true] %s2619_s27 }
 0x161   : > { %s589_s20 = scalar_lea.hbm %s2869_s6, %s1228_s7 }
 0x162   : > { %p612_p6 = scmp.gt.s32.totalorder %s2612_s8, 0  ;;  %s1799_s13 = scalar_lea.hbm %s589_s20, 16 }
 0x163   : > { %p1800_p7 = scmp.ne.s32.totalorder %s589_s20, %s1799_s13  ;;  %p1804_p9 = scmp.lt.s32.totalorder %s589_s20, %s2869_s6 }
 0x164   : > { %p1805_p2 = scmp.lt.s32.totalorder %s2292_s11, %s1799_s13 }
 0x165   : > { %p1801_p0 = pnand %p1800_p7, %p2509_p8 }
 0x166   : > { %p1806_p4 = por %p1805_p2, %p1804_p9 }
 0x167   : > { %p1802_p10 = pneg %p1801_p0 }
 0x169   : > { %p1807_p5 = pnand %p1806_p4, %p1802_p10 }
 0x16b   : > { %1810 = shalt.err (!%p1807_p5)  }
 0x16c   : > { %s1811_s29 = scalar_lea.vmem %s2610_s12, 16  ;;  %p1818_p12 = scmp.lt.s32.totalorder %s2610_s12, %s2302_s28 }
 0x16d   : > { %p1812_p11 = scmp.ne.s32.totalorder %s2610_s12, %s1811_s29  ;;  %p1819_p3 = scmp.lt.s32.totalorder %s2305_s30, %s1811_s29 }
 0x16f   : > { %p1813_p13 = pnand %p1812_p11, %p2509_p8  ;;  %p1820_p7 = por %p1819_p3, %p1818_p12 }
 0x171   : > { %p1814_p1 = pneg %p1813_p13 }
 0x173   : > { %p1821_p0 = pnand %p1820_p7, %p1814_p1 }
 0x175   : > { %1824 = shalt.err (!%p1821_p0)  }
 0x176   : > { %1396 = dma.hbm_to_vmem [thread:$0]  (%p2509_p8), %s589_s20, 16, %s2610_s12, %s2584_s1  ;;  %v780_v12 = vand.u32 127, %v779_v11  ;;  %v783_v13 = vpop.permute.xlu0 %782  ;;  %v796_v14 = vpop.permute.xlu1 %795 }
 0x177   : > { %s613_s24 = scalar_select %p612_p6, %s2612_s8, 0 }
 0x178   : > { %p1231_p10 = scmp.lt.s32.totalorder %s2612_s8, 63  ;;  %s1054_s18 = scalar_lea.vmem %s2550_s10, 3 [#allocation2]  ;;  %vm784_vm2 = vcmp.eq.s32.totalorder %v783_v13, %v780_v12  ;;  %vm797_vm3 = vcmp.eq.s32.totalorder %v796_v14, %v780_v12 }
 0x179   : > { %s2982_s3 = smov (!%p2509_p8, %s639_s3), 0  ;;  %s2659_s16 = sshll.u32 %s1054_s18, 4  ;;  %v1278_v17 = vsel %vm784_vm2, 1.0, %v2078_v2  ;;  %s658_s16 = int_to_ptr.vmem [resolvable:$true] %s2659_s16 }
 0x17a   : > { %s2984_s24 = smov (!%p1231_p10, %s613_s24), 63  ;;  %s2657_s7 = sld [smem:[%s1400_s19 + %s2982_s3]]  ;;  %v789_v15 = vpop.permute.xlu0 %788  ;;  %v803_v16 = vpop.permute.xlu1 %802 }
 0x17b   : > { %s1236_s12 = sshll.u32 %s2984_s24, 4  ;;  %vm790_vm4 = vcmp.eq.s32.totalorder %v789_v15, %v780_v12  ;;  %vm804_vm5 = vcmp.eq.s32.totalorder %v803_v16, %v780_v12  ;;  %s668_s13 = sadd.s32 4, %s2532_s17 }
 0x17c   : > { %s618_s20 = scalar_lea.hbm %s2869_s6, %s1236_s12  ;;  %v1279_v18 = vsel %vm790_vm4, 1.0, %v2078_v2 }
 0x17d   : > { %s1825_s3 = scalar_lea.hbm %s618_s20, 16  ;;  %p1830_p4 = scmp.lt.s32.totalorder %s618_s20, %s2869_s6 }
 0x17e   : > { %p1826_p6 = scmp.ne.s32.totalorder %s618_s20, %s1825_s3  ;;  %p1831_p5 = scmp.lt.s32.totalorder %s2292_s11, %s1825_s3 }
 0x180   : > { %p1827_p9 = pnand %p1826_p6, %p2509_p8  ;;  %p1832_p11 = por %p1831_p5, %p1830_p4 }
 0x182   : > { %p1828_p2 = pneg %p1827_p9 }
 0x184   : > { %p1833_p13 = pnand %p1832_p11, %p1828_p2 }
 0x186   : > { %1836 = shalt.err (!%p1833_p13)  }
 0x187   : > { %s1837_s2 = scalar_lea.vmem %s2652_s27, 16  ;;  %p1844_p7 = scmp.lt.s32.totalorder %s2652_s27, %s2302_s28 }
 0x188   : > { %p1838_p1 = scmp.ne.s32.totalorder %s2652_s27, %s1837_s2  ;;  %p1845_p0 = scmp.lt.s32.totalorder %s2305_s30, %s1837_s2 }
 0x18a   : > { %p1839_p12 = pnand %p1838_p1, %p2509_p8  ;;  %p1846_p10 = por %p1845_p0, %p1844_p7 }
 0x18c   : > { %p1840_p3 = pneg %p1839_p12 }
 0x18e   : > { %p1847_p6 = pnand %p1846_p10, %p1840_p3 }
 0x190   : > { %1850 = shalt.err (!%p1847_p6)  }
 0x191   : > { %1399 = dma.hbm_to_vmem [thread:$0]  (%p2509_p8), %s618_s20, 16, %s2652_s27, %s2584_s1  ;;  %v793_v19 = vadd.f32 %v1279_v18, %v1278_v17  ;;  %v1280_v20 = vsel %vm797_vm3, 1.0, %v2078_v2  ;;  %v1281_v21 = vsel %vm804_vm5, 1.0, %v2078_v2  ;;  %vm812_vm6 = vcmask 244736  }
 0x192   : > { %s1403_s29 = scalar_select %p2509_p8, [#allocation5], [#allocation58] }
 0x193   : > { %s2986_s13 = smov (!%p2509_p8, %s668_s13), 0  ;;  %v800_v22 = vadd.f32 %v1280_v20, %v793_v19  ;;  %p641_p9 = scmp.gt.s32.totalorder %s2657_s7, 0 }
 0x194   : > { %p1239_p2 = scmp.lt.s32.totalorder %s2657_s7, 63  ;;  %s2694_s24 = sld [smem:[%s1403_s29 + %s2986_s13]] }
 0x195   : > { %v807_v23 = vadd.f32 %v1281_v21, %v800_v22  ;;  %s2988_s7 = smov (!%p641_p9, %s2657_s7), 0  ;;  %s1059_s27 = scalar_lea.vmem %s2550_s10, 4 [#allocation2] }
 0x196   : > { %s2990_s7 = smov (!%p1239_p2, %s2988_s7), 63  ;;  %s697_s8 = sadd.s32 5, %s2532_s17 }
 0x197   : > { %1355 = vmatmul.mubr.msk.f32.vlgmr.msra.gmra.mxu0 %vm812_vm6, %v807_v23  ;;  %s1406_s18 = scalar_select %p2509_p8, [#allocation5], [#allocation59] }
 0x198   : > { %s1244_s12 = sshll.u32 %s2990_s7, 4 }
 0x199   : > { %s647_s3 = scalar_lea.hbm %s2869_s6, %s1244_s12 }
 0x19a   : > { %p670_p4 = scmp.gt.s32.totalorder %s2694_s24, 0  ;;  %s1851_s19 = scalar_lea.hbm %s647_s3, 16 }
 0x19b   : > { %p1852_p5 = scmp.ne.s32.totalorder %s647_s3, %s1851_s19  ;;  %p1856_p1 = scmp.lt.s32.totalorder %s647_s3, %s2869_s6 }
 0x19c   : > { %p1857_p12 = scmp.lt.s32.totalorder %s2292_s11, %s1851_s19 }
 0x19d   : > { %p1853_p11 = pnand %p1852_p5, %p2509_p8 }
 0x19e   : > { %p1858_p3 = por %p1857_p12, %p1856_p1 }
 0x19f   : > { %p1854_p13 = pneg %p1853_p11 }
 0x1a1   : > { %p1859_p7 = pnand %p1858_p3, %p1854_p13 }
 0x1a3   : > { %1862 = shalt.err (!%p1859_p7)  }
 0x1a4   : > { %s1863_s7 = scalar_lea.vmem %s658_s16, 16  ;;  %p1870_p9 = scmp.lt.s32.totalorder %s658_s16, %s2302_s28 }
 0x1a5   : > { %p1864_p0 = scmp.ne.s32.totalorder %s658_s16, %s1863_s7  ;;  %p1871_p2 = scmp.lt.s32.totalorder %s2305_s30, %s1863_s7 }
 0x1a7   : > { %p1865_p10 = pnand %p1864_p0, %p2509_p8  ;;  %p1872_p5 = por %p1871_p2, %p1870_p9 }
 0x1a9   : > { %p1866_p6 = pneg %p1865_p10 }
 0x1ab   : > { %p1873_p11 = pnand %p1872_p5, %p1866_p6 }
 0x1ad   : > { %1876 = shalt.err (!%p1873_p11)  }
 0x1ae   : > { %1402 = dma.hbm_to_vmem [thread:$0]  (%p2509_p8), %s647_s3, 16, %s658_s16, %s2584_s1 }
 0x1af   : > { %s671_s2 = scalar_select %p670_p4, %s2694_s24, 0 }
 0x1b0   : > { %p1247_p13 = scmp.lt.s32.totalorder %s2694_s24, 63  ;;  %s686_s29 = sshll.u32 %s1059_s27, 4  ;;  %s687_s29 = int_to_ptr.vmem [resolvable:$true] %s686_s29 }
 0x1b1   : > { %s2992_s8 = smov (!%p2509_p8, %s697_s8), 0 }
 0x1b2   : > { %s2994_s2 = smov (!%p1247_p13, %s671_s2), 63  ;;  %s698_s12 = sld [smem:[%s1406_s18 + %s2992_s8]] }
 0x1b3   : > { %s1252_s23 = sshll.u32 %s2994_s2, 4 }
 0x1b4   : > { %s676_s13 = scalar_lea.hbm %s2869_s6, %s1252_s23 }
 0x1b5   : > { %s1877_s21 = scalar_lea.hbm %s676_s13, 16  ;;  %p1882_p4 = scmp.lt.s32.totalorder %s676_s13, %s2869_s6 }
 0x1b6   : > { %p1878_p1 = scmp.ne.s32.totalorder %s676_s13, %s1877_s21  ;;  %p1883_p7 = scmp.lt.s32.totalorder %s2292_s11, %s1877_s21 }
 0x1b8   : > { %p1879_p12 = pnand %p1878_p1, %p2509_p8  ;;  %p1884_p0 = por %p1883_p7, %p1882_p4 }
 0x1ba   : > { %p1880_p3 = pneg %p1879_p12 }
 0x1bc   : > { %p1885_p10 = pnand %p1884_p0, %p1880_p3 }
 0x1be   : > { %1888 = shalt.err (!%p1885_p10)  }
 0x1bf   : > { %s1889_s27 = scalar_lea.vmem %s687_s29, 16  ;;  %p1896_p5 = scmp.lt.s32.totalorder %s687_s29, %s2302_s28 }
 0x1c0   : > { %p1890_p6 = scmp.ne.s32.totalorder %s687_s29, %s1889_s27  ;;  %p1897_p11 = scmp.lt.s32.totalorder %s2305_s30, %s1889_s27 }
 0x1c2   : > { %p1891_p9 = pnand %p1890_p6, %p2509_p8  ;;  %p1898_p13 = por %p1897_p11, %p1896_p5 }
 0x1c4   : > { %p1892_p2 = pneg %p1891_p9 }
 0x1c6   : > { %p1899_p1 = pnand %p1898_p13, %p1892_p2 }
 0x1c8   : > { %1902 = shalt.err (!%p1899_p1)  }
 0x1c9   : > { %1405 = dma.hbm_to_vmem [thread:$0]  (%p2509_p8), %s676_s13, 16, %s687_s29, %s2584_s1 }
 0x1ca   : > { %s1064_s18 = scalar_lea.vmem %s2550_s10, 5 [#allocation2]  ;;  %p699_p12 = scmp.gt.s32.totalorder %s698_s12, 0 }
 0x1cb   : > { %p1255_p3 = scmp.lt.s32.totalorder %s698_s12, 63  ;;  %s715_s8 = sshll.u32 %s1064_s18, 4  ;;  %s716_s8 = int_to_ptr.vmem [resolvable:$true] %s715_s8 }
 0x1cc   : > { %s2996_s12 = smov (!%p699_p12, %s698_s12), 0 }
 0x1cd   : > { %s2998_s12 = smov (!%p1255_p3, %s2996_s12), 63 }
 0x1ce   : > { %s1260_s3 = sshll.u32 %s2998_s12, 4 }
 0x1cf   : > { %s705_s23 = scalar_lea.hbm %s2869_s6, %s1260_s3 }
 0x1d0   : > { %s1903_s20 = scalar_lea.hbm %s705_s23, 16  ;;  %p1908_p10 = scmp.lt.s32.totalorder %s705_s23, %s2869_s6 }
 0x1d1   : > { %p1904_p4 = scmp.ne.s32.totalorder %s705_s23, %s1903_s20  ;;  %p1909_p6 = scmp.lt.s32.totalorder %s2292_s11, %s1903_s20 }
 0x1d3   : > { %p1905_p7 = pnand %p1904_p4, %p2509_p8  ;;  %p1910_p9 = por %p1909_p6, %p1908_p10 }
 0x1d5   : > { %p1906_p0 = pneg %p1905_p7 }
 0x1d7   : > { %p1911_p2 = pnand %p1910_p9, %p1906_p0 }
 0x1d9   : > { %1914 = shalt.err (!%p1911_p2)  }
 0x1da   : > { %s1915_s29 = scalar_lea.vmem %s716_s8, 16  ;;  %p1922_p1 = scmp.lt.s32.totalorder %s716_s8, %s2302_s28 }
 0x1db   : > { %p1916_p5 = scmp.ne.s32.totalorder %s716_s8, %s1915_s29  ;;  %p1923_p12 = scmp.lt.s32.totalorder %s2305_s30, %s1915_s29 }
 0x1dd   : > { %p1917_p11 = pnand %p1916_p5, %p2509_p8  ;;  %p1924_p3 = por %p1923_p12, %p1922_p1 }
 0x1df   : > { %p1918_p13 = pneg %p1917_p11 }
 0x1e1   : > { %p1925_p4 = pnand %p1924_p3, %p1918_p13 }
 0x1e3   : > { %1928 = shalt.err (!%p1925_p4)  }
 0x1e4   : > { %1408 = dma.hbm_to_vmem [thread:$0]  (%p2509_p8), %s705_s23, 16, %s716_s8, %s2584_s1 }
 0x1e5   : > { %s726_s12 = sadd.s32 6, %s2532_s17  ;;  %s755_s16 = sadd.s32 7, %s2532_s17 }
 0x1e6   : > { %s1409_s13 = scalar_select %p2509_p8, [#allocation5], [#allocation60] }
 0x1e7   : > { %s3000_s12 = smov (!%p2509_p8, %s726_s12), 0  ;;  %s3002_s16 = smov (!%p2509_p8, %s755_s16), 0 }
 0x1e8   : > { %s727_s24 = sld [smem:[%s1409_s13 + %s3000_s12]]  ;;  %s1069_s8 = scalar_lea.vmem %s2550_s10, 6 [#allocation2] }
 0x1e9   : > { %s1412_s27 = scalar_select %p2509_p8, [#allocation5], [#allocation61] }
 0x1ea   : > { %s744_s7 = sshll.u32 %s1069_s8, 4  ;;  %s745_s7 = int_to_ptr.vmem [resolvable:$true] %s744_s7 }
 0x1eb   : > { %s2771_s18 = sld [smem:[%s1412_s27 + %s3002_s16]] }
 0x1ee   : > { %p728_p7 = scmp.gt.s32.totalorder %s727_s24, 0  ;;  %p1263_p0 = scmp.lt.s32.totalorder %s727_s24, 63 }
 0x1f0   : > { %s3004_s24 = smov (!%p728_p7, %s727_s24), 0 }
 0x1f1   : > { %s3006_s24 = smov (!%p1263_p0, %s3004_s24), 63  ;;  %p757_p10 = scmp.gt.s32.totalorder %s2771_s18, 0 }
 0x1f2   : > { %s1268_s3 = sshll.u32 %s3006_s24, 4 }
 0x1f3   : > { %s734_s23 = scalar_lea.hbm %s2869_s6, %s1268_s3 }
 0x1f4   : > { %s1929_s20 = scalar_lea.hbm %s734_s23, 16  ;;  %p1934_p5 = scmp.lt.s32.totalorder %s734_s23, %s2869_s6 }
 0x1f5   : > { %p1930_p6 = scmp.ne.s32.totalorder %s734_s23, %s1929_s20  ;;  %p1935_p11 = scmp.lt.s32.totalorder %s2292_s11, %s1929_s20 }
 0x1f7   : > { %p1931_p9 = pnand %p1930_p6, %p2509_p8  ;;  %p1936_p13 = por %p1935_p11, %p1934_p5 }
 0x1f9   : > { %p1932_p2 = pneg %p1931_p9 }
 0x1fb   : > { %p1937_p1 = pnand %p1936_p13, %p1932_p2 }
 0x1fd   : > { %1940 = shalt.err (!%p1937_p1)  }
 0x1fe   : > { %s1941_s29 = scalar_lea.vmem %s745_s7, 16  ;;  %p1948_p7 = scmp.lt.s32.totalorder %s745_s7, %s2302_s28 }
 0x1ff   : > { %p1942_p12 = scmp.ne.s32.totalorder %s745_s7, %s1941_s29  ;;  %p1949_p0 = scmp.lt.s32.totalorder %s2305_s30, %s1941_s29 }
 0x201   : > { %p1943_p3 = pnand %p1942_p12, %p2509_p8  ;;  %p1950_p6 = por %p1949_p0, %p1948_p7 }
 0x203   : > { %p1944_p4 = pneg %p1943_p3 }
 0x205   : > { %p1951_p9 = pnand %p1950_p6, %p1944_p4 }
 0x207   : > { %1954 = shalt.err (!%p1951_p9)  }
 0x208   : > { %1411 = dma.hbm_to_vmem [thread:$0]  (%p2509_p8), %s734_s23, 16, %s745_s7, %s2584_s1 }
 0x209   : > { %s758_s12 = scalar_select %p757_p10, %s2771_s18, 0 }
 0x20a   : > { %p1271_p2 = scmp.lt.s32.totalorder %s2771_s18, 63  ;;  %s1074_s13 = scalar_lea.vmem %s2550_s10, 7 [#allocation2] }
 0x20b   : > { %s773_s16 = sshll.u32 %s1074_s13, 4  ;;  %s774_s16 = int_to_ptr.vmem [resolvable:$true] %s773_s16 }
 0x20c   : > { %s3008_s12 = smov (!%p1271_p2, %s758_s12), 63 }
 0x20d   : > { %s1276_s24 = sshll.u32 %s3008_s12, 4 }
 0x20e   : > { %s763_s3 = scalar_lea.hbm %s2869_s6, %s1276_s24 }
 0x20f   : > { %s1955_s2 = scalar_lea.hbm %s763_s3, 16  ;;  %p1960_p1 = scmp.lt.s32.totalorder %s763_s3, %s2869_s6 }
 0x210   : > { %p1956_p5 = scmp.ne.s32.totalorder %s763_s3, %s1955_s2  ;;  %p1961_p10 = scmp.lt.s32.totalorder %s2292_s11, %s1955_s2 }
 0x212   : > { %p1957_p11 = pnand %p1956_p5, %p2509_p8  ;;  %p1962_p12 = por %p1961_p10, %p1960_p1 }
 0x214   : > { %p1958_p13 = pneg %p1957_p11 }
 0x216   : > { %p1963_p3 = pnand %p1962_p12, %p1958_p13 }
 0x218   : > { %1966 = shalt.err (!%p1963_p3)  }
 0x219   : > { %s1967_s10 = scalar_lea.vmem %s774_s16, 16  ;;  %p1974_p6 = scmp.lt.s32.totalorder %s774_s16, %s2302_s28 }
 0x21a   : > { %p1968_p4 = scmp.ne.s32.totalorder %s774_s16, %s1967_s10  ;;  %p1975_p9 = scmp.lt.s32.totalorder %s2305_s30, %s1967_s10 }
 0x21c   : > { %p1969_p7 = pnand %p1968_p4, %p2509_p8  ;;  %p1976_p2 = por %p1975_p9, %p1974_p6 }
 0x21e   : > { %p1970_p0 = pneg %p1969_p7 }
 0x220   : > { %p1977_p5 = pnand %p1976_p2, %p1970_p0 }
 0x222   : > { %1980 = shalt.err (!%p1977_p5)  }
 0x223   : > { %1414 = dma.hbm_to_vmem [thread:$0]  (%p2509_p8), %s763_s3, 16, %s774_s16, %s2584_s1 }
 0x224   : > { %s280_s11 = scalar_lea.vmem [#allocation11], %s2242_s26 }
 0x257   : > { %v886_v24 = vpop.f32.mrf.mxu0 }
 0x259   : > { %v1356_v25 = vpop.f32.mrf.mxu0 }
 0x25a   : > { %2041 = dma.done.wait %s2285_s9, 128 }
 0x25b   : > { %2042 = vsyncadd %s2285_s9, 4294967168  ;;  %v896_v26 = vld [vmem:[%s2259_s25] sm:$0xff]  ;;  %s943_s30 = sshll.u32 %s280_s11, 4  ;;  %s2907_s18 = sld [smem:[#allocation77_spill]]  ;;  %s944_s30 = int_to_ptr.vmem [resolvable:$true] %s943_s30 }
 0x25c   : > { %v897_v27 = vadd.f32 %v896_v26, %v2232_v3  ;;  %v1285_v37 = vld [vmem:[%s2867_s4] ss:$0 sm:$0xff]  ;;  %s2908_s23 = sand.u32 1, %s2053_s0   ;;  %s1981_s21 = scalar_lea.vmem %s944_s30, 128 }
 0x25d   : > { %v1286_v39 = vld [vmem:[%s2868_s5] ss:$0 sm:$0xff]  ;;  %s929_s19 = scalar_lea.sflag [#allocation8], %s2908_s23  ;;  %p1982_p8 = scmp.ne.s32.totalorder %s944_s30, %s1981_s21 }
 0x25e   : > { %v898_v28 = vadd.f32 %v897_v27, %v886_v24  ;;  %p2909_p11 = scmp.ne.s32.totalorder %s2893_s15, 0  ;;  %s2083_s29 = smov [#allocation11]  }
 0x25f   : > { %s1985_s12 = sshll.u32 %s2083_s29, 4  ;;  %s1986_s12 = int_to_ptr.vmem [resolvable:$false] %s1985_s12 }
 0x260   : > { %899 = vadd.xlane.f32.xlu0 %v898_v28  ;;  %p1983_p13 = pnand %p1982_p8, %p2909_p11  ;;  %s1987_s13 = scalar_lea.vmem %s1986_s12, 256 }
 0x261   : > { %s941_s7 = scalar_lea.hbm %s2907_s18, %s2248_s14  ;;  %p1988_p10 = scmp.lt.s32.totalorder %s944_s30, %s1986_s12 }
 0x262   : > { %p1984_p1 = pneg %p1983_p13  ;;  %p1989_p12 = scmp.lt.s32.totalorder %s1987_s13, %s1981_s21 }
 0x264   : > { %p1990_p3 = por %p1989_p12, %p1988_p10 }
 0x266   : > { %p1991_p4 = pnand %p1990_p3, %p1984_p1 }
 0x2e9   : > { %v900_v29 = vpop.xlane.xlu0 %899 }
 0x2ea   : > { %v902_v30 = vmul.f32 0.0078125, %v900_v29 }
 0x2ec   : > { %v903_v31 = vsub.f32 %v898_v28, %v902_v30 }
 0x2ee   : > { %v904_v32 = vmul.f32 %v903_v31, %v903_v31 }
 0x2f0   : > { %905 = vadd.xlane.f32.xlu0 %v904_v32 }
 0x379   : > { %v906_v33 = vpop.xlane.xlu0 %905 }
 0x37a   : > { %v907_v34 = vmul.f32 0.0078125, %v906_v33 }
 0x37c   : > { %v908_v35 = vadd.f32 1e-12, %v907_v34 }
 0x37e   : > { %1499 = vrsqrt.f32 %v908_v35 }
 0x38b   : > { %v1500_v36 = vpop.eup %1499 }
 0x38c   : > { %v910_v38 = vmul.f32 %v1500_v36, %v903_v31 }
 0x38e   : > { %v918_v40 = vmul.f32 %v1285_v37, %v910_v38 }
 0x390   : > { %v926_v41 = vadd.f32 %v1286_v39, %v918_v40 }
 0x392   : > { %927 = vst [vmem:[%s280_s11] sm:$0xff] %v926_v41 }
 0x393   : > { %1994 = shalt.err (!%p1991_p4)
}
 0x394   : > { %s1995_s16 = scalar_lea.hbm %s941_s7, 128  ;;  %s1999_s27 = scalar_lea.hbm %s2907_s18, 256 }
 0x395   : > { %p1996_p7 = scmp.ne.s32.totalorder %s941_s7, %s1995_s16  ;;  %p2000_p9 = scmp.lt.s32.totalorder %s941_s7, %s2907_s18 }
 0x396   : > { %p2001_p2 = scmp.lt.s32.totalorder %s1999_s27, %s1995_s16 }
 0x397   : > { %p1997_p0 = pnand %p1996_p7, %p2909_p11 }
 0x398   : > { %p2002_p5 = por %p2001_p2, %p2000_p9 }
 0x399   : > { %p1998_p6 = pneg %p1997_p0 }
 0x39b   : > { %p2003_p8 = pnand %p2002_p5, %p1998_p6 }
 0x39d   : > { %2006 = shalt.err (!%p2003_p8)
}
 0x39e   : > { %1415 = dma.vmem_to_hbm [thread:$0]  (%p2909_p11), %s944_s30, 128, %s941_s7, %s929_s19  }
 0x39f PF: > { %s2910_s2 = sld [smem:[#allocation70_spill]] }
 0x3a0   : > { %s2911_s17 = sld [smem:[#allocation67_spill]] }
 0x3a1   : > { %s2912_s20 = sld [smem:[#allocation72_spill]] }
 0x3a5   : > { %p1434_p13 = scmp.ge.s32.totalorder %s2910_s2, 2 }
 0x3a6   : > { %s955_s10 = sand.u32 1, %s2911_s17  }
 0x3a7   : > { %p2913_p1 = scmp.ne.s32.totalorder %s2912_s20, 0  ;;  %s956_s11 = scalar_lea.sflag [#allocation8], %s955_s10 }
 0x3a9   : > { %p1425_p10 = pnand %p1434_p13, %p2913_p1 }
 0x3ab   : > { %p1426_p12 = pneg %p1425_p10 }
 0x3ad   : > { %2044 = dma.done.wait (%p1426_p12), %s956_s11, 128  }
 0x3ae   : > { %2046 = vsyncadd (%p1426_p12), %s956_s11, 4294967168  ;;  %s28_s10 = sadd.s32 1, %s2910_s2   ;;  %s2914_s9 = sld [smem:[#allocation68_spill]] }
 0x3af   : > { %p25_p3 = scmp.ge.s32.totalorder %s28_s10, 4   ;;  %s2915_s30 = sld [smem:[#allocation73_spill]] }
 0x3b0   : > { %s2916_s8 = sld [smem:[#allocation69_spill]]  ;;  %s2918_s29 = smov %s2053_s0 }
 0x3b1   : > { %s2917_s15 = sld [smem:[#allocation71_spill]] }
 0x3b3   :  { %27 = sbr.rel (!%p25_p3) target bundleno = 23 (0x17), region = 194 }
 0x3b4   : > { %s2919_s0 = smov %s2914_s9 }
 0x3b7   : > { %s2920_s9 = smov %s2917_s15 }
 0x3b8   :  { %961 = vsyncpa [#allocation7], 1 }
 0x3b9   :  { %963 = vsyncpa [#allocation7 + $0x1], 1 }
 0x3ba   :  { %964 = vsyncpa [#allocation10], 1 }
 0x3bb   :  { %965 = vsyncpa [#allocation8], 1 }
 0x3bc   :  { %967 = vsyncpa [#allocation8 + $0x1], 1 }
 0x3bd   :  { %968 = vsyncmov [#allocation3] }
 0x3c0   :  { %s969_s26 = vpop.sfrf %968 }
 0x3c1   :  { %p1291_p11 = scmp.ne.s32.totalorder %s969_s26, 0 }
 0x3c3   :  { %973 = shalt.err (%p1291_p11)  }
 0x3c4   :  { %975 = vsyncmov [#allocation3 + $0x1] }
 0x3c7   :  { %s976_s25 = vpop.sfrf %975 }
 0x3c8   :  { %p1292_p4 = scmp.ne.s32.totalorder %s976_s25, 0 }
 0x3ca   :  { %980 = shalt.err (%p1292_p4)  }

</bundles_post_ra>
